<compile_context>
chip_gen: v6e
topology: v6e:2x2x1
jax: 0.10.0
libtpu: 0.0.40
codegen_flags: <defaults>
</compile_context>

<pallas_src>
import functools

import jax
import jax.numpy as jnp
from jax.experimental import pallas as pl
from jax.experimental.pallas import tpu as pltpu


def _round_up(x, m):
    return ((x + m - 1) // m) * m


# ----------------------------------------------------------------------------
# Filterbank construction (plain-JAX glue; deterministic, no file loading)
# ----------------------------------------------------------------------------
def _make_filters(H, W, J, L):
    """Gabor band-pass filters psi_{j,theta} and Gaussian low-pass phi."""
    yy = (jnp.arange(H) + H // 2) % H - H // 2          # periodic, centered at 0
    xx = (jnp.arange(W) + W // 2) % W - W // 2
    Y, X = jnp.meshgrid(yy.astype(jnp.float32), xx.astype(jnp.float32),
                        indexing="ij")

    sigma0 = 0.8
    psis_r, psis_i = [], []
    for j in range(J):
        sigma = sigma0 * (2.0 ** j)
        xi = 3.0 * jnp.pi / 4.0 / (2.0 ** j)
        env = jnp.exp(-(X ** 2 + Y ** 2) / (2.0 * sigma ** 2))
        for l in range(L):
            theta = jnp.pi * l / L
            arg = xi * (X * jnp.cos(theta) + Y * jnp.sin(theta))
            pr = env * jnp.cos(arg)
            pi = env * jnp.sin(arg)
            # remove DC component from the real part (band-pass filter)
            pr = pr - env * (pr.sum() / env.sum())
            norm = 1.0 / (2.0 * jnp.pi * sigma ** 2)
            psis_r.append(pr * norm)
            psis_i.append(pi * norm)

    sigma_phi = sigma0 * (2.0 ** J)
    phi = jnp.exp(-(X ** 2 + Y ** 2) / (2.0 * sigma_phi ** 2))
    phi = phi / phi.sum()

    return (jnp.stack(psis_r).astype(jnp.float32),
            jnp.stack(psis_i).astype(jnp.float32),
            phi.astype(jnp.float32))


def _circulant_2d(h):
    """Return K (HW, HW) s.t. (K @ x_flat) is the 2-D circular conv of x with h."""
    H, W = h.shape
    idx = jnp.arange(H * W)
    ny, nx = idx // W, idx % W
    dy = (ny[:, None] - ny[None, :]) % H
    dx = (nx[:, None] - nx[None, :]) % W
    return h[dy, dx]


def _pick_filters_per_step(P, N):
    """Largest divisor of P s.t. the fused psi block stays small and grid >= 2."""
    bytes_per_filter = 2 * N * (2 * N)          # bf16 (N, 2N) block per filter
    cap = max(1, (4 * 1024 * 1024) // max(1, bytes_per_filter))
    target = min(cap, max(1, P // 2)) if P >= 2 else 1
    fp = 1
    for d in range(1, P + 1):
        if P % d == 0 and d <= target:
            fp = d
    return fp


# ----------------------------------------------------------------------------
# Pallas kernel: FP band-pass filters per grid step g.
#   URI       = X @ [Kr_0|Ki_0|...|Kr_{FP-1}|Ki_{FP-1}]  (one wide bf16 matmul)
#   U_f       = sqrt(ur_f^2 + ui_f^2)                    (f32 VPU/EUP modulus)
#   S1[g,f]   = U_f @ K_phi_pad                          (lane-dense 128 cols)
# ----------------------------------------------------------------------------
def _scattering_kernel(xf_ref, kri_ref, kphi_ref, s1_ref, *, n, fp, npad):
    xf = xf_ref[...]                      # (Mp, N)        bf16
    kri = kri_ref[0]                      # (N, FP*2N)     bf16 (r|i per filter)
    kphi = kphi_ref[...]                  # (N, Npad)      bf16 (zero-padded)

    # One fused MXU matmul for the real+imag parts of all FP filters (f32 acc).
    uri = jnp.dot(xf, kri, preferred_element_type=jnp.float32)   # (Mp, FP*2N)

    for f in range(fp):                   # static unrolled loop (FP small)
        ur = uri[:, f * 2 * n: f * 2 * n + n]
        ui = uri[:, f * 2 * n + n: (f + 1) * 2 * n]
        # Modulus non-linearity in f32 (v5e has no bf16 VALU). Forward-only.
        u = jnp.sqrt(ur * ur + ui * ui)
        s1_ref[:, f * npad:(f + 1) * npad] = jnp.dot(
            u.astype(jnp.bfloat16), kphi,
            preferred_element_type=jnp.float32)                  # (Mp, Npad)


@functools.partial(jax.jit, static_argnames=("Ho", "Wo"))
def _scattering_apply(x, kri_grouped_bf16, kphi_pad_bf16, kphi_f32, *, Ho, Wo):
    B, C, H, W = x.shape
    N, Npad = kphi_pad_bf16.shape
    G, _, width = kri_grouped_bf16.shape
    FP = width // (2 * N)
    P = G * FP
    n_out = Ho * Wo

    M = B * C
    Mp = max(8, _round_up(M, 8))          # pad rows to a sublane multiple

    xf = x.reshape(M, N).astype(jnp.float32)
    xf_pad = jnp.zeros((Mp, N), jnp.bfloat16).at[:M, :].set(
        xf.astype(jnp.bfloat16))

    kernel = functools.partial(_scattering_kernel, n=N, fp=FP, npad=Npad)

    s1_flat = pl.pallas_call(
        kernel,
        out_shape=jax.ShapeDtypeStruct((Mp, P * Npad), jnp.float32),
        grid_spec=pltpu.PrefetchScalarGridSpec(
            num_scalar_prefetch=0,
            grid=(G,),
            in_specs=[
                pl.BlockSpec((Mp, N), lambda g: (0, 0)),              # x (bf16)
                pl.BlockSpec((1, N, FP * 2 * N), lambda g: (g, 0, 0)),  # psi r|i
                pl.BlockSpec((N, Npad), lambda g: (0, 0)),            # phi (pad)
            ],
            out_specs=pl.BlockSpec((Mp, FP * Npad), lambda g: (0, g)),  # slab
        ),
        compiler_params=pltpu.CompilerParams(
            dimension_semantics=("parallel",),       # filter groups shard TCs
            vmem_limit_bytes=32 * 1024 * 1024),
    )(xf_pad, kri_grouped_bf16, kphi_pad_bf16)

    # Zeroth order: one tiny f32 matmul in plain JAX (keeps the Pallas grid
    # free of the constant-index S0 block so "parallel" semantics is safe).
    s0 = jnp.dot(xf, kphi_f32, preferred_element_type=jnp.float32)  # (M, n_out)

    s1 = s1_flat[:M].reshape(M, P, Npad)[:, :, :n_out]
    s1 = s1.reshape(B, C, P, Ho, Wo)
    s0 = s0.reshape(B, C, 1, Ho, Wo)
    return jnp.concatenate([s0, s1], axis=2)          # (B, C, 1 + P, Ho, Wo)


# ----------------------------------------------------------------------------
# Concrete "ScatteringTorch"-style module (build / register filters / forward)
# ----------------------------------------------------------------------------
class ScatteringPallas:
    def __init__(self, shape, J=2, L=4):
        self.H, self.W = shape
        self.J, self.L = J, L
        self.build()

    def build(self):
        self.create_and_register_filters()

    def create_and_register_filters(self):
        H, W, J, L = self.H, self.W, self.J, self.L
        psi_r, psi_i, phi = _make_filters(H, W, J, L)

        N = H * W
        P = J * L

        # Circulant conv matrices, transposed so y = x_flat @ K^T, then the
        # real/imag parts are fused into one (P, N, 2N) RHS.
        kpsi_r_t = jax.vmap(lambda h: _circulant_2d(h).T)(psi_r)   # (P, N, N)
        kpsi_i_t = jax.vmap(lambda h: _circulant_2d(h).T)(psi_i)   # (P, N, N)
        kri = jnp.concatenate([kpsi_r_t, kpsi_i_t], axis=-1)       # (P, N, 2N)

        # Group FP filters per grid step: (G, N, FP*2N), filter f of group g
        # occupies columns [f*2N, (f+1)*2N).
        FP = _pick_filters_per_step(P, N)
        G = P // FP
        kri_grouped = (kri.reshape(G, FP, N, 2 * N)
                          .transpose(0, 2, 1, 3)
                          .reshape(G, N, FP * 2 * N))

        stride = 2 ** J
        self.Ho, self.Wo = H // stride, W // stride
        n_out = self.Ho * self.Wo
        kphi = _circulant_2d(phi)                                   # (N, N)
        out_idx = ((jnp.arange(self.Ho) * stride)[:, None] * W
                   + (jnp.arange(self.Wo) * stride)[None, :]).reshape(-1)
        kphi_t = kphi[out_idx].T                                    # (N, n_out) f32

        npad = max(128, _round_up(n_out, 128))
        kphi_pad = jnp.zeros((N, npad), jnp.float32).at[:, :n_out].set(kphi_t)

        # "registered buffers"
        self.kri_grouped_bf16 = kri_grouped.astype(jnp.bfloat16)
        self.kphi_pad_bf16 = kphi_pad.astype(jnp.bfloat16)
        self.kphi_f32 = kphi_t                                      # for S0

    def scattering(self, x):
        return _scattering_apply(x, self.kri_grouped_bf16, self.kphi_pad_bf16,
                                 self.kphi_f32, Ho=self.Ho, Wo=self.Wo)

    def forward(self, x):
        return self.scattering(x)

    __call__ = forward


# ----------------------------------------------------------------------------
if __name__ == "__main__":
    B, C, H, W = 2, 4, 16, 16
    J, L = 2, 4

    key = jax.random.PRNGKey(0)
    x = jax.random.normal(key, (B, C, H, W), dtype=jnp.float32)

    scat = ScatteringPallas((H, W), J=J, L=L)
    out = scat(x)
    out = jax.block_until_ready(out)

    expected_shape = (B, C, 1 + J * L, H // 2 ** J, W // 2 ** J)
    assert out.shape == expected_shape, (out.shape, expected_shape)
    assert out.dtype == jnp.float32
    assert bool(jnp.all(jnp.isfinite(out)))

    print("KERNEL_OK")
</pallas_src>

<mosaic_0001>
module attributes {stable_mosaic.version = 11 : i64} {
  func.func @_scattering_kernel(%arg0: i32, %arg1: memref<8x256xbf16, #tpu.memory_space<vmem>>, %arg2: memref<1x256x2048xbf16, #tpu.memory_space<vmem>>, %arg3: memref<256x128xbf16, #tpu.memory_space<vmem>>, %arg4: memref<8x512xf32, #tpu.memory_space<vmem>>) attributes {dimension_semantics = [#tpu.dimension_semantics<parallel>], iteration_bounds = array<i64: 2>, scalar_prefetch = 0 : i64, scratch_operands = 0 : i64, tpu.core_type = #tpu.core_type<tc>, window_params = [{pipeline_mode = #tpu.pipeline_mode<synchronous>, transform_indices = @transform_0, window_bounds = array<i64: 8, 256>}, {transform_indices = @transform_1, window_bounds = array<i64: 1, 256, 2048>}, {pipeline_mode = #tpu.pipeline_mode<synchronous>, transform_indices = @transform_2, window_bounds = array<i64: 256, 128>}, {transform_indices = @transform_3, window_bounds = array<i64: 8, 512>}]} {
    %c0 = arith.constant 0 : index
    %c0_0 = arith.constant 0 : index
    %0 = vector.load %arg1[%c0, %c0_0] : memref<8x256xbf16, #tpu.memory_space<vmem>>, vector<8x256xbf16>
    %c0_1 = arith.constant 0 : index
    %c0_2 = arith.constant 0 : index
    %c0_3 = arith.constant 0 : index
    %1 = vector.load %arg2[%c0_1, %c0_2, %c0_3] : memref<1x256x2048xbf16, #tpu.memory_space<vmem>>, vector<1x256x2048xbf16>
    %2 = vector.shape_cast %1 : vector<1x256x2048xbf16> to vector<256x2048xbf16>
    %c0_4 = arith.constant 0 : index
    %c0_5 = arith.constant 0 : index
    %3 = vector.load %arg3[%c0_4, %c0_5] : memref<256x128xbf16, #tpu.memory_space<vmem>>, vector<256x128xbf16>
    %cst = arith.constant dense<0.000000e+00> : vector<8x2048xf32>
    %4 = tpu.matmul %0, %2, %cst {dimension_numbers = #tpu.dot_dimension_numbers<[1], [0], [0], [1], [0, 0, 1, 1], [], []>} : vector<8x256xbf16>, vector<256x2048xbf16>, vector<8x2048xf32> -> vector<8x2048xf32>
    %5 = vector.extract_strided_slice %4 {offsets = [0, 0], sizes = [8, 256], strides = [1, 1]} : vector<8x2048xf32> to vector<8x256xf32>
    %6 = vector.extract_strided_slice %4 {offsets = [0, 256], sizes = [8, 256], strides = [1, 1]} : vector<8x2048xf32> to vector<8x256xf32>
    %7 = arith.mulf %5, %5 : vector<8x256xf32>
    %8 = arith.mulf %6, %6 : vector<8x256xf32>
    %9 = arith.addf %7, %8 : vector<8x256xf32>
    %10 = math.sqrt %9 : vector<8x256xf32>
    %11 = arith.truncf %10 : vector<8x256xf32> to vector<8x256xbf16>
    %cst_6 = arith.constant dense<0.000000e+00> : vector<8x128xf32>
    %12 = tpu.matmul %11, %3, %cst_6 {dimension_numbers = #tpu.dot_dimension_numbers<[1], [0], [0], [1], [0, 0, 1, 1], [], []>} : vector<8x256xbf16>, vector<256x128xbf16>, vector<8x128xf32> -> vector<8x128xf32>
    %c0_7 = arith.constant 0 : index
    %c0_8 = arith.constant 0 : index
    %13 = vector.load %arg4[%c0_7, %c0_8] : memref<8x512xf32, #tpu.memory_space<vmem>>, vector<8x128xf32>
    tpu.vector_store %arg4[%c0_7, %c0_8], %12 {strides = array<i32>} : memref<8x512xf32, #tpu.memory_space<vmem>>, vector<8x128xf32>,
    %14 = vector.extract_strided_slice %4 {offsets = [0, 512], sizes = [8, 256], strides = [1, 1]} : vector<8x2048xf32> to vector<8x256xf32>
    %15 = vector.extract_strided_slice %4 {offsets = [0, 768], sizes = [8, 256], strides = [1, 1]} : vector<8x2048xf32> to vector<8x256xf32>
    %16 = arith.mulf %14, %14 : vector<8x256xf32>
    %17 = arith.mulf %15, %15 : vector<8x256xf32>
    %18 = arith.addf %16, %17 : vector<8x256xf32>
    %19 = math.sqrt %18 : vector<8x256xf32>
    %20 = arith.truncf %19 : vector<8x256xf32> to vector<8x256xbf16>
    %cst_9 = arith.constant dense<0.000000e+00> : vector<8x128xf32>
    %21 = tpu.matmul %20, %3, %cst_9 {dimension_numbers = #tpu.dot_dimension_numbers<[1], [0], [0], [1], [0, 0, 1, 1], [], []>} : vector<8x256xbf16>, vector<256x128xbf16>, vector<8x128xf32> -> vector<8x128xf32>
    %c0_10 = arith.constant 0 : index
    %c128 = arith.constant 128 : index
    %22 = vector.load %arg4[%c0_10, %c128] : memref<8x512xf32, #tpu.memory_space<vmem>>, vector<8x128xf32>
    tpu.vector_store %arg4[%c0_10, %c128], %21 {strides = array<i32>} : memref<8x512xf32, #tpu.memory_space<vmem>>, vector<8x128xf32>,
    %23 = vector.extract_strided_slice %4 {offsets = [0, 1024], sizes = [8, 256], strides = [1, 1]} : vector<8x2048xf32> to vector<8x256xf32>
    %24 = vector.extract_strided_slice %4 {offsets = [0, 1280], sizes = [8, 256], strides = [1, 1]} : vector<8x2048xf32> to vector<8x256xf32>
    %25 = arith.mulf %23, %23 : vector<8x256xf32>
    %26 = arith.mulf %24, %24 : vector<8x256xf32>
    %27 = arith.addf %25, %26 : vector<8x256xf32>
    %28 = math.sqrt %27 : vector<8x256xf32>
    %29 = arith.truncf %28 : vector<8x256xf32> to vector<8x256xbf16>
    %cst_11 = arith.constant dense<0.000000e+00> : vector<8x128xf32>
    %30 = tpu.matmul %29, %3, %cst_11 {dimension_numbers = #tpu.dot_dimension_numbers<[1], [0], [0], [1], [0, 0, 1, 1], [], []>} : vector<8x256xbf16>, vector<256x128xbf16>, vector<8x128xf32> -> vector<8x128xf32>
    %c0_12 = arith.constant 0 : index
    %c256 = arith.constant 256 : index
    %31 = vector.load %arg4[%c0_12, %c256] : memref<8x512xf32, #tpu.memory_space<vmem>>, vector<8x128xf32>
    tpu.vector_store %arg4[%c0_12, %c256], %30 {strides = array<i32>} : memref<8x512xf32, #tpu.memory_space<vmem>>, vector<8x128xf32>,
    %32 = vector.extract_strided_slice %4 {offsets = [0, 1536], sizes = [8, 256], strides = [1, 1]} : vector<8x2048xf32> to vector<8x256xf32>
    %33 = vector.extract_strided_slice %4 {offsets = [0, 1792], sizes = [8, 256], strides = [1, 1]} : vector<8x2048xf32> to vector<8x256xf32>
    %34 = arith.mulf %32, %32 : vector<8x256xf32>
    %35 = arith.mulf %33, %33 : vector<8x256xf32>
    %36 = arith.addf %34, %35 : vector<8x256xf32>
    %37 = math.sqrt %36 : vector<8x256xf32>
    %38 = arith.truncf %37 : vector<8x256xf32> to vector<8x256xbf16>
    %cst_13 = arith.constant dense<0.000000e+00> : vector<8x128xf32>
    %39 = tpu.matmul %38, %3, %cst_13 {dimension_numbers = #tpu.dot_dimension_numbers<[1], [0], [0], [1], [0, 0, 1, 1], [], []>} : vector<8x256xbf16>, vector<256x128xbf16>, vector<8x128xf32> -> vector<8x128xf32>
    %c0_14 = arith.constant 0 : index
    %c384 = arith.constant 384 : index
    %40 = vector.load %arg4[%c0_14, %c384] : memref<8x512xf32, #tpu.memory_space<vmem>>, vector<8x128xf32>
    tpu.vector_store %arg4[%c0_14, %c384], %39 {strides = array<i32>} : memref<8x512xf32, #tpu.memory_space<vmem>>, vector<8x128xf32>,
    return
  }
  func.func @transform_0(%arg0: i32) -> (i32, i32) {
    %c0_i32 = arith.constant 0 : i32
    %c0_i32_0 = arith.constant 0 : i32
    %c0_i32_1 = arith.constant 0 : i32
    return %c0_i32, %c0_i32_0 : i32, i32
  }
  func.func @transform_1(%arg0: i32) -> (i32, i32, i32) {
    %c0_i32 = arith.constant 0 : i32
    %c0_i32_0 = arith.constant 0 : i32
    %c0_i32_1 = arith.constant 0 : i32
    return %arg0, %c0_i32, %c0_i32_0 : i32, i32, i32
  }
  func.func @transform_2(%arg0: i32) -> (i32, i32) {
    %c0_i32 = arith.constant 0 : i32
    %c0_i32_0 = arith.constant 0 : i32
    %c0_i32_1 = arith.constant 0 : i32
    return %c0_i32, %c0_i32_0 : i32, i32
  }
  func.func @transform_3(%arg0: i32) -> (i32, i32) {
    %c0_i32 = arith.constant 0 : i32
    %c0_i32_0 = arith.constant 0 : i32
    return %c0_i32, %arg0 : i32, i32
  }
}

</mosaic_0001>

<bundles_post_ra>
// kernel: _scattering_apply.1
= control target key start
LH: loop header
LB: loop body
LE: loop exit
PB: predicated region body
PF: predicated region fallthrough
CT: control target
= control target key end

     0   :  { %8 = vsyncpa [#allocation3], 0  ;;  %s3636_s0 = inlined_call_operand.vmem [shape: bf16[8,256], index: 0, kind: input, shape index: {}]   ;;  %s3637_s1 = inlined_call_operand.hbm [shape: bf16[2,256,2048], index: 1, kind: input, shape index: {}]   ;;  %s3638_s2 = inlined_call_operand.hbm [shape: bf16[256,128], index: 2, kind: input, shape index: {}]   ;;  %s3639_s3 = inlined_call_operand.vmem [shape: f32[8,1024], index: 3, kind: output, shape index: {}]  }
   0x1   :  { %10 = vsyncpa [#allocation3 + $0x1], 0 }
   0x2   :  { %11 = vsyncpa [#allocation5], 0  ;;  %s3121_s12 = smov 0   ;;  %s3123_s13 = smov 0  }
   0x3   :  { %s3125_s14 = smov 0   ;;  %s3127_s15 = smov 0  }
   0x4 LB: > { %s2537_s16 = sadd.s32 4294967295, %s3094_s15   ;;  %p58_p0 = scmp.ne.s32.totalorder %s3086_s13, %s3082_s12  ;;  %s3094_s15 = sphi %s3127_s15, %s3655_s15   ;;  %s3090_s14 = sphi %s3125_s14, %s3654_s14   ;;  %s3086_s13 = sphi %s3123_s13, %s3653_s13   ;;  %s3082_s12 = sphi %s3121_s12, %s3652_s12  }
   0x5   : > { %p3143_p1 = scmp.eq.s32.totalorder %s2537_s16, 0  ;;  %p2539_p2 = scmp.ge.s32.totalorder %s3094_s15, 1 }
   0x6   : > { %p116_p3 = scmp.lt.s32.totalorder %s3094_s15, 3  ;;  %s3096_s20 = smov [#allocation4]  }
   0x7   : > { %s3644_s17 = scalar_select %p3143_p1, 1, 0 }
   0x8   : > { %p3151_p4 = por %p3143_p1, %p58_p0  ;;  %p3155_p5 = pnand %p2539_p2, %p116_p3 }
   0x9   : > { %s131_s21 = sshll.u32 %s3096_s20, 4  ;;  %s3168_s23 = sadd.s32 1, %s3094_s15   ;;  %s132_s21 = int_to_ptr.vmem [resolvable:$true] %s131_s21 }
   0xa   : > { %s3645_s18 = scalar_select %p3151_p4, 1, 0 }
   0xb   : > { %s3646_s19 = scalar_select %p3155_p5, 1, 0 }
   0xc   : > { %p2921_p6 = pneg %p3155_p5  ;;  %s45_s24 = sadd.s32 1, %s3090_s14 }
   0xd   : > { %s42_s25 = ssub.s32 %s3094_s15, %s3168_s23  ;;  %s3013_s26 = scalar_lea.vmem %s132_s21, 2048 }
   0xe   : > { %p3163_p7 = pnand %p2921_p6, %p3143_p1  ;;  %p3014_p9 = scmp.ne.s32.totalorder %s132_s21, %s3013_s26 }
   0xf   : > { %p3021_p12 = scmp.lt.s32.totalorder %s132_s21, %s132_s21  ;;  %p3022_p13 = scmp.lt.s32.totalorder %s3013_s26, %s3013_s26 }
  0x10   : > { %p3004_p8 = pneg %p3163_p7 }
  0x11   : > { %p3023_p0 = por %p3022_p13, %p3021_p12 }
  0x12   : > { %p3016_p10 = pnand %p3014_p9, %p3004_p8 }
  0x14   : > { %p3017_p11 = pneg %p3016_p10 }
  0x16   : > { %p3024_p2 = pnand %p3023_p0, %p3017_p11 }
  0x18   : > { %3027 = shalt.err (!%p3024_p2)
}
  0x19   : > { %s3097_s27 = smov 64   ;;  %s3098_s28 = smov 4  }
  0x1a   : > { %2924 = dma.hbm_to_vmem [thread:$0]  (!%p3163_p7), %s3638_s2, 2048, %s132_s21, [#allocation5], %s3097_s27, %s3097_s27, %s3098_s28  }
  0x1b   : > { %p43_p3 = scmp.eq.s32.totalorder %s42_s25, 0  ;;  %p52_p6 = scmp.ne.s32.totalorder %s3090_s14, %s3086_s13 }
  0x1c   : > { %p53_p8 = scmp.eq.s32.totalorder %s3094_s15, 0  ;;  %p2930_p9 = scmp.lt.s32.totalorder %s3094_s15, 2 }
  0x1d   : > { %s3187_s4 = scalar_select %p43_p3, %s3090_s14, %s45_s24  }
  0x1e   : > { %p54_p10 = por %p53_p8, %p52_p6  ;;  %s145_s5 = sand.u32 1, %s3090_s14  }
  0x1f   : > { %s2542_s6 = sshll.u32 %s145_s5, 11  ;;  %s2826_s7 = sshll.u32 %s3094_s15, 15 }
  0x20   : > { %s3194_s10 = scalar_lea.hbm %s3637_s1, %s2826_s7  ;;  %s149_s11 = scalar_lea.vmem [#allocation2], %s2542_s6 }
  0x21   : > { %s156_s12 = sshll.u32 %s149_s11, 4  ;;  %p3198_p7 = pnand %p2930_p9, %p54_p10  ;;  %s3196_s12 = int_to_ptr.vmem [resolvable:$true] %s156_s12 }
  0x22   : > { %s3202_s21 = scalar_lea.sflag [#allocation3], %s145_s5  ;;  %s3028_s22 = scalar_lea.hbm %s3194_s10, 32768 }
  0x23   : > { %p3029_p11 = scmp.ne.s32.totalorder %s3194_s10, %s3028_s22  ;;  %p3030_p12 = pneg %p3198_p7 }
  0x24   : > { %s3033_s26 = scalar_lea.hbm %s3637_s1, 65536  ;;  %p3034_p2 = scmp.lt.s32.totalorder %s3194_s10, %s3637_s1 }
  0x25   : > { %p3031_p13 = pnand %p3030_p12, %p3029_p11  ;;  %p3035_p3 = scmp.lt.s32.totalorder %s3033_s26, %s3028_s22 }
  0x27   : > { %p3032_p0 = pneg %p3031_p13  ;;  %p3036_p6 = por %p3035_p3, %p3034_p2 }
  0x29   : > { %p3037_p8 = pnand %p3036_p6, %p3032_p0 }
  0x2b   : > { %3040 = shalt.err (!%p3037_p8)
}
  0x2c   : > { %s3041_s30 = scalar_lea.vmem %s3196_s12, 32768  ;;  %s3099_s5 = smov [#allocation2]  }
  0x2d   : > { %p3042_p9 = scmp.ne.s32.totalorder %s3196_s12, %s3041_s30  ;;  %s3046_s6 = sshll.u32 %s3099_s5, 4  ;;  %s3047_s6 = int_to_ptr.vmem [resolvable:$false] %s3046_s6 }
  0x2e   : > { %s3048_s7 = scalar_lea.vmem %s3047_s6, 65536  ;;  %p3049_p13 = scmp.lt.s32.totalorder %s3196_s12, %s3047_s6 }
  0x2f   : > { %p3044_p10 = pnand %p3042_p9, %p3030_p12  ;;  %p3050_p1 = scmp.lt.s32.totalorder %s3048_s7, %s3041_s30 }
  0x31   : > { %p3045_p11 = pneg %p3044_p10  ;;  %p3051_p4 = por %p3050_p1, %p3049_p13 }
  0x33   : > { %p3052_p5 = pnand %p3051_p4, %p3045_p11 }
  0x35   : > { %3055 = shalt.err (!%p3052_p5)
}
  0x36   : > { %s3100_s8 = smov 1024   ;;  %p3649_p12 = scmp.ne.s32.totalorder %s3646_s19, 0 }
  0x37   : > { %2928 = dma.hbm_to_vmem [thread:$0]  (!%p3198_p7), %s3194_s10, 32768, %s3196_s12, %s3202_s21, %s3100_s8, %s3100_s8, %s3097_s27  }
  0x38   : > { %168 = sbr.rel (%p3649_p12) target bundleno = 744 (0x2e8), region = 32  ;;  %s170_s9 = sand.u32 (!%p3649_p12), 1, %s3086_s13  }
  0x39   : > { %s2546_s11 = sshll.u32 (!%p3649_p12), %s170_s9, 11  ;;  %s171_s22 = scalar_lea.sflag (!%p3649_p12), [#allocation3], %s170_s9 }
  0x3a   : > { %s3227_s24 = scalar_lea.vmem (!%p3649_p12), [#allocation2], %s2546_s11  ;;  %p3650_p1 = scmp.ne.s32.totalorder (!%p3649_p12), %s3645_s18, 0 }
  0x3d   : > { %3073 = dma.done.wait (%p3650_p1), %s171_s22, 32768  }
  0x3e   : > { %3075 = vsyncadd (%p3650_p1), %s171_s22, 4294934528  ;;  %p3651_p4 = scmp.ne.s32.totalorder %s3644_s17, 0 }
  0x40   : > { %3077 = dma.done.wait (%p3651_p4), [#allocation5], 2048  }
  0x41   : > { %3079 = vsyncadd (%p3651_p4), [#allocation5], 4294965248  ;;  %v321_v0 = vld [vmem:[%s3227_s24 + $0x380] sm:$0xff]  ;;  %v322_v2 = vld [vmem:[%s3227_s24 + $0x388] sm:$0xff]  ;;  %s2548_s19 = sshll.u32 %s2537_s16, 2 }
  0x42   : > { %v329_v1 = vld [vmem:[%s3227_s24 + $0x3c0] sm:$0xff]  ;;  %v330_v4 = vld [vmem:[%s3227_s24 + $0x3c8] sm:$0xff]  ;;  %p202_p5 = scmp.lt.s32.totalorder %s2548_s19, 7 }
  0x43   : > { %v2665_v3 = vcombine.high %v321_v0, %v329_v1  ;;  %v2664_v5 = vcombine.low %v321_v0, %v329_v1  ;;  %v305_v6 = vld [vmem:[%s3227_s24 + $0x300] sm:$0xff]  ;;  %v2667_v8 = vcombine.high %v322_v2, %v330_v4  ;;  %v2666_v9 = vcombine.low %v322_v2, %v330_v4  ;;  %v306_v11 = vld [vmem:[%s3227_s24 + $0x308] sm:$0xff] }
  0x44   : > { %v313_v7 = vld [vmem:[%s3227_s24 + $0x340] sm:$0xff]  ;;  %v314_v12 = vld [vmem:[%s3227_s24 + $0x348] sm:$0xff]  ;;  %s3657_s19 = smov (!%p202_p5, %s2548_s19), 7 }
  0x45   : > { %v2649_v10 = vcombine.high %v305_v6, %v313_v7  ;;  %v289_v13 = vld [vmem:[%s3227_s24 + $0x280] sm:$0xff]  ;;  %1784 = vmatprep.subr.bf16.mxu0 %v2665_v3  ;;  %v2651_v14 = vcombine.high %v306_v11, %v314_v12  ;;  %v290_v16 = vld [vmem:[%s3227_s24 + $0x288] sm:$0xff]  ;;  %1825 = vmatprep.subr.bf16.mxu1 %v2667_v8  ;;  %v2648_v18 = vcombine.low %v305_v6, %v313_v7  ;;  %s2549_s15 = sshll.u32 %s3657_s19, 3 }
  0x46   : > { %v297_v15 = vld [vmem:[%s3227_s24 + $0x2c0] sm:$0xff]  ;;  %v298_v17 = vld [vmem:[%s3227_s24 + $0x2c8] sm:$0xff]  ;;  %1785 = vmatpush1.bf16.msra.mxu0 %v2664_v5  ;;  %1826 = vmatpush1.bf16.msra.mxu1 %v2666_v9  ;;  %v2650_v19 = vcombine.low %v306_v11, %v314_v12  ;;  %s205_s10 = scalar_lea.vmem %s3639_s3, %s2549_s15 }
  0x47   : > { %1786 = vmatprep.subr.bf16.mxu0 %v2649_v10  ;;  %v2633_v20 = vcombine.high %v289_v13, %v297_v15  ;;  %1827 = vmatprep.subr.bf16.mxu1 %v2651_v14  ;;  %v2635_v21 = vcombine.high %v290_v16, %v298_v17  ;;  %v273_v22 = vld [vmem:[%s3227_s24 + $0x200] sm:$0xff]  ;;  %v274_v24 = vld [vmem:[%s3227_s24 + $0x208] sm:$0xff]  ;;  %v2632_v26 = vcombine.low %v289_v13, %v297_v15 }
  0x48   : > { %v281_v23 = vld [vmem:[%s3227_s24 + $0x240] sm:$0xff]  ;;  %v282_v25 = vld [vmem:[%s3227_s24 + $0x248] sm:$0xff]  ;;  %v2634_v27 = vcombine.low %v290_v16, %v298_v17 }
  0x49   : > { %v2617_v28 = vcombine.high %v273_v22, %v281_v23  ;;  %v2619_v29 = vcombine.high %v274_v24, %v282_v25  ;;  %v257_v30 = vld [vmem:[%s3227_s24 + $0x180] sm:$0xff]  ;;  %v258_v32 = vld [vmem:[%s3227_s24 + $0x188] sm:$0xff]  ;;  %v2616_v34 = vcombine.low %v273_v22, %v281_v23  ;;  %v2618_v35 = vcombine.low %v274_v24, %v282_v25 }
  0x4a   : > { %1787 = vmatpush1.bf16.msra.mxu0 %v2648_v18  ;;  %1828 = vmatpush1.bf16.msra.mxu1 %v2650_v19  ;;  %v265_v31 = vld [vmem:[%s3227_s24 + $0x1c0] sm:$0xff]  ;;  %v266_v33 = vld [vmem:[%s3227_s24 + $0x1c8] sm:$0xff] }
  0x4b   : > { %1788 = vmatprep.subr.bf16.mxu0 %v2633_v20  ;;  %1829 = vmatprep.subr.bf16.mxu1 %v2635_v21  ;;  %v2601_v36 = vcombine.high %v257_v30, %v265_v31  ;;  %v2603_v37 = vcombine.high %v258_v32, %v266_v33  ;;  %v241_v38 = vld [vmem:[%s3227_s24 + $0x100] sm:$0xff]  ;;  %v242_v40 = vld [vmem:[%s3227_s24 + $0x108] sm:$0xff]  ;;  %v2600_v42 = vcombine.low %v257_v30, %v265_v31 }
  0x4c   : > { %v249_v39 = vld [vmem:[%s3227_s24 + $0x140] sm:$0xff]  ;;  %v250_v41 = vld [vmem:[%s3227_s24 + $0x148] sm:$0xff]  ;;  %v2602_v43 = vcombine.low %v258_v32, %v266_v33 }
  0x4d   : > { %v2585_v44 = vcombine.high %v241_v38, %v249_v39  ;;  %v2587_v45 = vcombine.high %v242_v40, %v250_v41  ;;  %v225_v46 = vld [vmem:[%s3227_s24 + $0x80] sm:$0xff]  ;;  %v226_v48 = vld [vmem:[%s3227_s24 + $0x88] sm:$0xff]  ;;  %v2584_v50 = vcombine.low %v241_v38, %v249_v39  ;;  %v2586_v51 = vcombine.low %v242_v40, %v250_v41 }
  0x4e   : > { %1789 = vmatpush1.bf16.msra.mxu0 %v2632_v26  ;;  %1830 = vmatpush1.bf16.msra.mxu1 %v2634_v27  ;;  %v233_v47 = vld [vmem:[%s3227_s24 + $0xc0] sm:$0xff]  ;;  %v234_v49 = vld [vmem:[%s3227_s24 + $0xc8] sm:$0xff] }
  0x4f   : > { %1790 = vmatprep.subr.bf16.mxu0 %v2617_v28  ;;  %1831 = vmatprep.subr.bf16.mxu1 %v2619_v29  ;;  %v2569_v52 = vcombine.high %v225_v46, %v233_v47  ;;  %v3268_v53 = vld [vmem:[%s3636_s0] sm:$0xff]  ;;  %v2571_v54 = vcombine.high %v226_v48, %v234_v49  ;;  %v210_v58 = vld [vmem:[%s3227_s24 + $0x8] sm:$0xff]  ;;  %v2568_v60 = vcombine.low %v225_v46, %v233_v47 }
  0x50   : > { %v209_v55 = vld [vmem:[%s3227_s24] sm:$0xff]  ;;  %v3274_v57 = vcombine.high %v3268_v53, %v3268_v53  ;;  %v218_v59 = vld [vmem:[%s3227_s24 + $0x48] sm:$0xff]  ;;  %v2570_v61 = vcombine.low %v226_v48, %v234_v49 }
  0x51   : > { %v217_v56 = vld [vmem:[%s3227_s24 + $0x40] sm:$0xff]  ;;  %v2555_v63 = vcombine.high %v210_v58, %v218_v59  ;;  %v450_v2 = vld [vmem:[%s3227_s24 + $0x788] sm:$0xff]  ;;  %v2554_v5 = vcombine.low %v210_v58, %v218_v59 }
  0x52   : > { %1791 = vmatpush1.bf16.msra.mxu0 %v2616_v34  ;;  %1832 = vmatpush1.bf16.msra.mxu1 %v2618_v35  ;;  %v2553_v62 = vcombine.high %v209_v55, %v217_v56  ;;  %v449_v0 = vld [vmem:[%s3227_s24 + $0x780] sm:$0xff]  ;;  %v458_v3 = vld [vmem:[%s3227_s24 + $0x7c8] sm:$0xff]  ;;  %v2552_v4 = vcombine.low %v209_v55, %v217_v56 }
  0x53   : > { %1792 = vmatprep.subr.bf16.mxu0 %v2601_v36  ;;  %1833 = vmatprep.subr.bf16.mxu1 %v2603_v37  ;;  %v457_v1 = vld [vmem:[%s3227_s24 + $0x7c0] sm:$0xff]  ;;  %v2795_v7 = vcombine.high %v450_v2, %v458_v3  ;;  %v434_v10 = vld [vmem:[%s3227_s24 + $0x708] sm:$0xff]  ;;  %v2794_v13 = vcombine.low %v450_v2, %v458_v3  ;;  %v323_v2 = vld [vmem:[%s3227_s24 + $0x390] sm:$0xff] }
  0x54   : > { %1816 = vmatprep.mubr.bf16.mxu0 %v3274_v57  ;;  %1857 = vmatprep.mubr.bf16.mxu1 %v3274_v57  ;;  %v2793_v6 = vcombine.high %v449_v0, %v457_v1  ;;  %v433_v8 = vld [vmem:[%s3227_s24 + $0x700] sm:$0xff]  ;;  %v442_v11 = vld [vmem:[%s3227_s24 + $0x748] sm:$0xff]  ;;  %v2792_v12 = vcombine.low %v449_v0, %v457_v1  ;;  %v331_v3 = vld [vmem:[%s3227_s24 + $0x3d0] sm:$0xff] }
  0x55   : > { %v441_v9 = vld [vmem:[%s3227_s24 + $0x740] sm:$0xff]  ;;  %v2779_v15 = vcombine.high %v434_v10, %v442_v11  ;;  %v418_v18 = vld [vmem:[%s3227_s24 + $0x688] sm:$0xff]  ;;  %v2778_v21 = vcombine.low %v434_v10, %v442_v11  ;;  %v307_v10 = vld [vmem:[%s3227_s24 + $0x310] sm:$0xff] }
  0x56   : > { %1793 = vmatpush1.bf16.msra.mxu0 %v2600_v42  ;;  %1834 = vmatpush1.bf16.msra.mxu1 %v2602_v43  ;;  %v2777_v14 = vcombine.high %v433_v8, %v441_v9  ;;  %v417_v16 = vld [vmem:[%s3227_s24 + $0x680] sm:$0xff]  ;;  %v426_v19 = vld [vmem:[%s3227_s24 + $0x6c8] sm:$0xff]  ;;  %v2776_v20 = vcombine.low %v433_v8, %v441_v9  ;;  %v2669_v8 = vcombine.high %v323_v2, %v331_v3  ;;  %v315_v11 = vld [vmem:[%s3227_s24 + $0x350] sm:$0xff] }
  0x57   : > { %1794 = vmatprep.subr.bf16.mxu0 %v2585_v44  ;;  %1835 = vmatprep.subr.bf16.mxu1 %v2587_v45  ;;  %v425_v17 = vld [vmem:[%s3227_s24 + $0x6c0] sm:$0xff]  ;;  %v2763_v23 = vcombine.high %v418_v18, %v426_v19  ;;  %v402_v26 = vld [vmem:[%s3227_s24 + $0x608] sm:$0xff]  ;;  %v2762_v29 = vcombine.low %v418_v18, %v426_v19  ;;  %v291_v18 = vld [vmem:[%s3227_s24 + $0x290] sm:$0xff] }
  0x58   : > { %v2761_v22 = vcombine.high %v417_v16, %v425_v17  ;;  %v401_v24 = vld [vmem:[%s3227_s24 + $0x600] sm:$0xff]  ;;  %v410_v27 = vld [vmem:[%s3227_s24 + $0x648] sm:$0xff]  ;;  %v2760_v28 = vcombine.low %v417_v16, %v425_v17  ;;  %v2653_v17 = vcombine.high %v307_v10, %v315_v11  ;;  %v299_v19 = vld [vmem:[%s3227_s24 + $0x2d0] sm:$0xff] }
  0x59   : > { %v409_v25 = vld [vmem:[%s3227_s24 + $0x640] sm:$0xff]  ;;  %v2747_v31 = vcombine.high %v402_v26, %v410_v27  ;;  %v386_v34 = vld [vmem:[%s3227_s24 + $0x588] sm:$0xff]  ;;  %v2746_v37 = vcombine.low %v402_v26, %v410_v27  ;;  %v283_v26 = vld [vmem:[%s3227_s24 + $0x250] sm:$0xff] }
  0x5a   : > { %1795 = vmatpush1.bf16.msra.mxu0 %v2584_v50  ;;  %1836 = vmatpush1.bf16.msra.mxu1 %v2586_v51  ;;  %v2745_v30 = vcombine.high %v401_v24, %v409_v25  ;;  %v385_v32 = vld [vmem:[%s3227_s24 + $0x580] sm:$0xff]  ;;  %v394_v35 = vld [vmem:[%s3227_s24 + $0x5c8] sm:$0xff]  ;;  %v2744_v36 = vcombine.low %v401_v24, %v409_v25  ;;  %v2637_v24 = vcombine.high %v291_v18, %v299_v19  ;;  %v275_v25 = vld [vmem:[%s3227_s24 + $0x210] sm:$0xff] }
  0x5b   : > { %1796 = vmatprep.subr.bf16.mxu0 %v2569_v52  ;;  %1837 = vmatprep.subr.bf16.mxu1 %v2571_v54  ;;  %v393_v33 = vld [vmem:[%s3227_s24 + $0x5c0] sm:$0xff]  ;;  %v2731_v39 = vcombine.high %v386_v34, %v394_v35  ;;  %v370_v42 = vld [vmem:[%s3227_s24 + $0x508] sm:$0xff]  ;;  %v2730_v45 = vcombine.low %v386_v34, %v394_v35  ;;  %v276_v27 = vld [vmem:[%s3227_s24 + $0x218] sm:$0xff] }
  0x5c   : > { %v2729_v38 = vcombine.high %v385_v32, %v393_v33  ;;  %v369_v40 = vld [vmem:[%s3227_s24 + $0x500] sm:$0xff]  ;;  %v378_v43 = vld [vmem:[%s3227_s24 + $0x548] sm:$0xff]  ;;  %v2728_v44 = vcombine.low %v385_v32, %v393_v33  ;;  %v2621_v32 = vcombine.high %v275_v25, %v283_v26  ;;  %v259_v33 = vld [vmem:[%s3227_s24 + $0x190] sm:$0xff] }
  0x5d   : > { %v377_v41 = vld [vmem:[%s3227_s24 + $0x540] sm:$0xff]  ;;  %v2715_v47 = vcombine.high %v370_v42, %v378_v43  ;;  %v354_v50 = vld [vmem:[%s3227_s24 + $0x488] sm:$0xff]  ;;  %v2714_v54 = vcombine.low %v370_v42, %v378_v43  ;;  %v267_v34 = vld [vmem:[%s3227_s24 + $0x1d0] sm:$0xff] }
  0x5e   : > { %1797 = vmatpush1.bf16.msra.mxu0 %v2568_v60  ;;  %1838 = vmatpush1.bf16.msra.mxu1 %v2570_v61  ;;  %v2713_v46 = vcombine.high %v369_v40, %v377_v41  ;;  %v353_v48 = vld [vmem:[%s3227_s24 + $0x480] sm:$0xff]  ;;  %v362_v51 = vld [vmem:[%s3227_s24 + $0x4c8] sm:$0xff]  ;;  %v2712_v52 = vcombine.low %v369_v40, %v377_v41  ;;  %v260_v35 = vld [vmem:[%s3227_s24 + $0x198] sm:$0xff]  ;;  %v2605_v40 = vcombine.high %v259_v33, %v267_v34 }
  0x5f   : > { %1798 = vmatprep.subr.bf16.mxu0 %v2553_v62  ;;  %1839 = vmatprep.subr.bf16.mxu1 %v2555_v63  ;;  %v361_v49 = vld [vmem:[%s3227_s24 + $0x4c0] sm:$0xff]  ;;  %v2699_v56 = vcombine.high %v354_v50, %v362_v51  ;;  %v338_v60 = vld [vmem:[%s3227_s24 + $0x408] sm:$0xff]  ;;  %v2698_v63 = vcombine.low %v354_v50, %v362_v51  ;;  %v243_v41 = vld [vmem:[%s3227_s24 + $0x110] sm:$0xff] }
  0x60   : > { %v2697_v55 = vcombine.high %v353_v48, %v361_v49  ;;  %v337_v58 = vld [vmem:[%s3227_s24 + $0x400] sm:$0xff]  ;;  %v346_v61 = vld [vmem:[%s3227_s24 + $0x448] sm:$0xff]  ;;  %v2696_v62 = vcombine.low %v353_v48, %v361_v49  ;;  %v251_v42 = vld [vmem:[%s3227_s24 + $0x150] sm:$0xff] }
  0x61   : > { %v345_v59 = vld [vmem:[%s3227_s24 + $0x440] sm:$0xff]  ;;  %v2683_v1 = vcombine.high %v338_v60, %v346_v61  ;;  %v244_v43 = vld [vmem:[%s3227_s24 + $0x118] sm:$0xff]  ;;  %v2589_v48 = vcombine.high %v243_v41, %v251_v42  ;;  %v227_v50 = vld [vmem:[%s3227_s24 + $0x90] sm:$0xff] }
  0x62   : > { %1799 = vmatpush1.bf16.msra.mxu0 %v2552_v4  ;;  %1840 = vmatpush1.bf16.msra.mxu1 %v2554_v5  ;;  %v2681_v0 = vcombine.high %v337_v58, %v345_v59  ;;  %v324_v4 = vld [vmem:[%s3227_s24 + $0x398] sm:$0xff]  ;;  %v235_v51 = vld [vmem:[%s3227_s24 + $0xd0] sm:$0xff] }
  0x63   : > { %1800 = vmatprep.subr.bf16.mxu0 %v2793_v6  ;;  %1841 = vmatprep.subr.bf16.mxu1 %v2795_v7  ;;  %v332_v5 = vld [vmem:[%s3227_s24 + $0x3d8] sm:$0xff]  ;;  %v2680_v6 = vcombine.low %v337_v58, %v345_v59  ;;  %v2682_v7 = vcombine.low %v338_v60, %v346_v61  ;;  %v2573_v58 = vcombine.high %v227_v50, %v235_v51  ;;  %v211_v60 = vld [vmem:[%s3227_s24 + $0x10] sm:$0xff] }
  0x64   : > { %v2671_v9 = vcombine.high %v324_v4, %v332_v5  ;;  %v2670_v16 = vcombine.low %v324_v4, %v332_v5  ;;  %v219_v61 = vld [vmem:[%s3227_s24 + $0x50] sm:$0xff] }
  0x65   : > { %v451_v4 = vld [vmem:[%s3227_s24 + $0x790] sm:$0xff] }
  0x66   : > { %1801 = vmatpush2.bf16.msra.mxu0 %v2792_v12  ;;  %1842 = vmatpush2.bf16.msra.mxu1 %v2794_v13  ;;  %v3320_v12 = vcombine.low %v3268_v53, %v3268_v53  ;;  %v308_v13 = vld [vmem:[%s3227_s24 + $0x318] sm:$0xff]  ;;  %v2652_v53 = vcombine.low %v307_v10, %v315_v11  ;;  %v459_v5 = vld [vmem:[%s3227_s24 + $0x7d0] sm:$0xff] }
  0x67   : > { %1802 = vmatprep.subr.bf16.mxu0 %v2777_v14  ;;  %1843 = vmatprep.subr.bf16.mxu1 %v2779_v15  ;;  %v316_v14 = vld [vmem:[%s3227_s24 + $0x358] sm:$0xff]  ;;  %v2668_v15 = vcombine.low %v323_v2, %v331_v3  ;;  %v2557_v2 = vcombine.high %v211_v60, %v219_v61  ;;  %v2797_v10 = vcombine.high %v451_v4, %v459_v5 }
  0x6a   : > { %1803 = vmatpush2.bf16.msra.mxu0 %v2776_v20  ;;  %1844 = vmatpush2.bf16.msra.mxu1 %v2778_v21  ;;  %v292_v20 = vld [vmem:[%s3227_s24 + $0x298] sm:$0xff]  ;;  %v2655_v21 = vcombine.high %v308_v13, %v316_v14 }
  0x6b   : > { %1804 = vmatprep.subr.bf16.mxu0 %v2761_v22  ;;  %1845 = vmatprep.subr.bf16.mxu1 %v2763_v23  ;;  %v300_v22 = vld [vmem:[%s3227_s24 + $0x2d8] sm:$0xff]  ;;  %v2654_v23 = vcombine.low %v308_v13, %v316_v14  ;;  %v435_v13 = vld [vmem:[%s3227_s24 + $0x710] sm:$0xff] }
  0x6c   : > { %v443_v14 = vld [vmem:[%s3227_s24 + $0x750] sm:$0xff] }
  0x6e   : > { %1805 = vmatpush2.bf16.msra.mxu0 %v2760_v28  ;;  %1846 = vmatpush2.bf16.msra.mxu1 %v2762_v29  ;;  %v2639_v28 = vcombine.high %v292_v20, %v300_v22  ;;  %v284_v29 = vld [vmem:[%s3227_s24 + $0x258] sm:$0xff] }
  0x6f   : > { %1806 = vmatprep.subr.bf16.mxu0 %v2745_v30  ;;  %1847 = vmatprep.subr.bf16.mxu1 %v2747_v31  ;;  %v2636_v30 = vcombine.low %v291_v18, %v299_v19  ;;  %v2638_v31 = vcombine.low %v292_v20, %v300_v22  ;;  %v2781_v19 = vcombine.high %v435_v13, %v443_v14  ;;  %v427_v22 = vld [vmem:[%s3227_s24 + $0x6d0] sm:$0xff] }
  0x72   : > { %1807 = vmatpush2.bf16.msra.mxu0 %v2744_v36  ;;  %1848 = vmatpush2.bf16.msra.mxu1 %v2746_v37  ;;  %v2623_v36 = vcombine.high %v276_v27, %v284_v29  ;;  %v268_v37 = vld [vmem:[%s3227_s24 + $0x1d8] sm:$0xff] }
  0x73   : > { %1808 = vmatprep.subr.bf16.mxu0 %v2729_v38  ;;  %1849 = vmatprep.subr.bf16.mxu1 %v2731_v39  ;;  %v2620_v38 = vcombine.low %v275_v25, %v283_v26  ;;  %v2622_v39 = vcombine.low %v276_v27, %v284_v29  ;;  %v411_v29 = vld [vmem:[%s3227_s24 + $0x650] sm:$0xff] }
  0x76   : > { %1809 = vmatpush2.bf16.msra.mxu0 %v2728_v44  ;;  %1850 = vmatpush2.bf16.msra.mxu1 %v2730_v45  ;;  %v2607_v44 = vcombine.high %v260_v35, %v268_v37  ;;  %v252_v45 = vld [vmem:[%s3227_s24 + $0x158] sm:$0xff] }
  0x77   : > { %1810 = vmatprep.subr.bf16.mxu0 %v2713_v46  ;;  %1851 = vmatprep.subr.bf16.mxu1 %v2715_v47  ;;  %v2604_v46 = vcombine.low %v259_v33, %v267_v34  ;;  %v2606_v47 = vcombine.low %v260_v35, %v268_v37  ;;  %v2591_v49 = vcombine.high %v244_v43, %v252_v45  ;;  %v395_v37 = vld [vmem:[%s3227_s24 + $0x5d0] sm:$0xff] }
  0x7a   : > { %1811 = vmatpush2.bf16.msra.mxu0 %v2712_v52  ;;  %1852 = vmatpush2.bf16.msra.mxu1 %v2714_v54  ;;  %v228_v52 = vld [vmem:[%s3227_s24 + $0x98] sm:$0xff] }
  0x7b   : > { %1812 = vmatprep.subr.bf16.mxu0 %v2697_v55  ;;  %1853 = vmatprep.subr.bf16.mxu1 %v2699_v56  ;;  %v236_v54 = vld [vmem:[%s3227_s24 + $0xd8] sm:$0xff]  ;;  %v2588_v55 = vcombine.low %v243_v41, %v251_v42  ;;  %v2590_v56 = vcombine.low %v244_v43, %v252_v45  ;;  %v379_v45 = vld [vmem:[%s3227_s24 + $0x550] sm:$0xff] }
  0x7c   : > { %v2575_v59 = vcombine.high %v228_v52, %v236_v54 }
  0x7e   : > { %1813 = vmatpush2.bf16.msra.mxu0 %v2696_v62  ;;  %1854 = vmatpush2.bf16.msra.mxu1 %v2698_v63  ;;  %v212_v62 = vld [vmem:[%s3227_s24 + $0x18] sm:$0xff] }
  0x7f   : > { %1814 = vmatprep.subr.bf16.mxu0 %v2681_v0  ;;  %1855 = vmatprep.subr.bf16.mxu1 %v2683_v1  ;;  %v220_v63 = vld [vmem:[%s3227_s24 + $0x58] sm:$0xff]  ;;  %v2572_v0 = vcombine.low %v227_v50, %v235_v51  ;;  %v2574_v1 = vcombine.low %v228_v52, %v236_v54  ;;  %v355_v52 = vld [vmem:[%s3227_s24 + $0x490] sm:$0xff] }
  0x80   : > { %v2559_v3 = vcombine.high %v212_v62, %v220_v63  ;;  %v363_v54 = vld [vmem:[%s3227_s24 + $0x4d0] sm:$0xff] }
  0x82   : > { %1815 = vmatpush2.bf16.msra.mxu0 %v2680_v6  ;;  %1856 = vmatpush2.bf16.msra.mxu1 %v2682_v7  ;;  %v452_v6 = vld [vmem:[%s3227_s24 + $0x798] sm:$0xff] }
  0x83   : > { %1866 = vmatprep.subr.bf16.mxu0 %v2669_v8  ;;  %1907 = vmatprep.subr.bf16.mxu1 %v2671_v9  ;;  %v460_v7 = vld [vmem:[%s3227_s24 + $0x7d8] sm:$0xff]  ;;  %v2556_v8 = vcombine.low %v211_v60, %v219_v61  ;;  %v2558_v9 = vcombine.low %v212_v62, %v220_v63  ;;  %v2701_v60 = vcombine.high %v355_v52, %v363_v54  ;;  %v339_v62 = vld [vmem:[%s3227_s24 + $0x410] sm:$0xff] }
  0x84   : > { %v2799_v11 = vcombine.high %v452_v6, %v460_v7  ;;  %v2798_v18 = vcombine.low %v452_v6, %v460_v7  ;;  %v347_v63 = vld [vmem:[%s3227_s24 + $0x450] sm:$0xff]  ;;  %v325_v6 = vld [vmem:[%s3227_s24 + $0x3a0] sm:$0xff] }
  0x85   : > { %1817 = vmatmul.mubr.bf16.vlgmr.msra.gmra.mxu0 %v3320_v12  ;;  %1858 = vmatmul.mubr.bf16.vlgmr.msra.gmra.mxu1 %v3320_v12  ;;  %v333_v7 = vld [vmem:[%s3227_s24 + $0x3e0] sm:$0xff] }
  0x86   : > { %1867 = vmatpush1.bf16.msra.mxu0 %v2668_v15  ;;  %1908 = vmatpush1.bf16.msra.mxu1 %v2670_v16  ;;  %v436_v15 = vld [vmem:[%s3227_s24 + $0x718] sm:$0xff] }
  0x87   : > { %1868 = vmatprep.subr.bf16.mxu0 %v2653_v17  ;;  %1909 = vmatprep.subr.bf16.mxu1 %v2655_v21  ;;  %v444_v16 = vld [vmem:[%s3227_s24 + $0x758] sm:$0xff]  ;;  %v2796_v17 = vcombine.low %v451_v4, %v459_v5  ;;  %v419_v21 = vld [vmem:[%s3227_s24 + $0x690] sm:$0xff]  ;;  %v2685_v4 = vcombine.high %v339_v62, %v347_v63 }
  0x88   : > { %1898 = vmatprep.mubr.bf16.mxu0 %v3274_v57  ;;  %1939 = vmatprep.mubr.bf16.mxu1 %v3274_v57  ;;  %v2783_v20 = vcombine.high %v436_v15, %v444_v16  ;;  %v2782_v25 = vcombine.low %v436_v15, %v444_v16  ;;  %v2765_v26 = vcombine.high %v419_v21, %v427_v22  ;;  %v309_v15 = vld [vmem:[%s3227_s24 + $0x320] sm:$0xff] }
  0x89   : > { %v317_v16 = vld [vmem:[%s3227_s24 + $0x360] sm:$0xff] }
  0x8a   : > { %1869 = vmatpush1.bf16.msra.mxu0 %v2652_v53  ;;  %1910 = vmatpush1.bf16.msra.mxu1 %v2654_v23  ;;  %v420_v53 = vld [vmem:[%s3227_s24 + $0x698] sm:$0xff] }
  0x8b   : > { %1870 = vmatprep.subr.bf16.mxu0 %v2637_v24  ;;  %1911 = vmatprep.subr.bf16.mxu1 %v2639_v28  ;;  %v428_v23 = vld [vmem:[%s3227_s24 + $0x6d8] sm:$0xff]  ;;  %v2780_v24 = vcombine.low %v435_v13, %v443_v14  ;;  %v403_v28 = vld [vmem:[%s3227_s24 + $0x610] sm:$0xff]  ;;  %v2673_v13 = vcombine.high %v325_v6, %v333_v7 }
  0x8c   : > { %v2767_v27 = vcombine.high %v420_v53, %v428_v23  ;;  %v2766_v33 = vcombine.low %v420_v53, %v428_v23  ;;  %v2749_v34 = vcombine.high %v403_v28, %v411_v29  ;;  %v293_v53 = vld [vmem:[%s3227_s24 + $0x2a0] sm:$0xff] }
  0x8d   : > { %v301_v23 = vld [vmem:[%s3227_s24 + $0x2e0] sm:$0xff] }
  0x8e   : > { %1871 = vmatpush1.bf16.msra.mxu0 %v2636_v30  ;;  %1912 = vmatpush1.bf16.msra.mxu1 %v2638_v31  ;;  %v404_v30 = vld [vmem:[%s3227_s24 + $0x618] sm:$0xff] }
  0x8f   : > { %1872 = vmatprep.subr.bf16.mxu0 %v2621_v32  ;;  %1913 = vmatprep.subr.bf16.mxu1 %v2623_v36  ;;  %v412_v31 = vld [vmem:[%s3227_s24 + $0x658] sm:$0xff]  ;;  %v2764_v32 = vcombine.low %v419_v21, %v427_v22  ;;  %v387_v36 = vld [vmem:[%s3227_s24 + $0x590] sm:$0xff]  ;;  %v2657_v21 = vcombine.high %v309_v15, %v317_v16 }
  0x90   : > { %v2751_v35 = vcombine.high %v404_v30, %v412_v31  ;;  %v2750_v41 = vcombine.low %v404_v30, %v412_v31  ;;  %v2733_v42 = vcombine.high %v387_v36, %v395_v37  ;;  %v277_v30 = vld [vmem:[%s3227_s24 + $0x220] sm:$0xff] }
  0x91   : > { %v285_v31 = vld [vmem:[%s3227_s24 + $0x260] sm:$0xff] }
  0x92   : > { %1873 = vmatpush1.bf16.msra.mxu0 %v2620_v38  ;;  %1914 = vmatpush1.bf16.msra.mxu1 %v2622_v39  ;;  %v388_v38 = vld [vmem:[%s3227_s24 + $0x598] sm:$0xff] }
  0x93   : > { %1874 = vmatprep.subr.bf16.mxu0 %v2605_v40  ;;  %1915 = vmatprep.subr.bf16.mxu1 %v2607_v44  ;;  %v396_v39 = vld [vmem:[%s3227_s24 + $0x5d8] sm:$0xff]  ;;  %v2748_v40 = vcombine.low %v403_v28, %v411_v29  ;;  %v371_v44 = vld [vmem:[%s3227_s24 + $0x510] sm:$0xff]  ;;  %v2641_v28 = vcombine.high %v293_v53, %v301_v23 }
  0x94   : > { %v2735_v43 = vcombine.high %v388_v38, %v396_v39  ;;  %v2717_v50 = vcombine.high %v371_v44, %v379_v45 }
  0x96   : > { %1875 = vmatpush1.bf16.msra.mxu0 %v2604_v46  ;;  %1916 = vmatpush1.bf16.msra.mxu1 %v2606_v47  ;;  %v372_v46 = vld [vmem:[%s3227_s24 + $0x518] sm:$0xff] }
  0x97   : > { %1876 = vmatprep.subr.bf16.mxu0 %v2589_v48  ;;  %1917 = vmatprep.subr.bf16.mxu1 %v2591_v49  ;;  %v380_v47 = vld [vmem:[%s3227_s24 + $0x558] sm:$0xff]  ;;  %v2732_v48 = vcombine.low %v387_v36, %v395_v37  ;;  %v2734_v49 = vcombine.low %v388_v38, %v396_v39  ;;  %v2625_v36 = vcombine.high %v277_v30, %v285_v31  ;;  %v261_v38 = vld [vmem:[%s3227_s24 + $0x1a0] sm:$0xff] }
  0x98   : > { %v2719_v51 = vcombine.high %v372_v46, %v380_v47  ;;  %v269_v39 = vld [vmem:[%s3227_s24 + $0x1e0] sm:$0xff] }
  0x9a   : > { %1877 = vmatpush1.bf16.msra.mxu0 %v2588_v55  ;;  %1918 = vmatpush1.bf16.msra.mxu1 %v2590_v56  ;;  %v356_v55 = vld [vmem:[%s3227_s24 + $0x498] sm:$0xff] }
  0x9b   : > { %1878 = vmatprep.subr.bf16.mxu0 %v2573_v58  ;;  %1919 = vmatprep.subr.bf16.mxu1 %v2575_v59  ;;  %v364_v56 = vld [vmem:[%s3227_s24 + $0x4d8] sm:$0xff]  ;;  %v2716_v58 = vcombine.low %v371_v44, %v379_v45  ;;  %v2718_v59 = vcombine.low %v372_v46, %v380_v47  ;;  %v2609_v44 = vcombine.high %v261_v38, %v269_v39  ;;  %v245_v46 = vld [vmem:[%s3227_s24 + $0x120] sm:$0xff] }
  0x9c   : > { %v2703_v61 = vcombine.high %v356_v55, %v364_v56  ;;  %v253_v47 = vld [vmem:[%s3227_s24 + $0x160] sm:$0xff] }
  0x9e   : > { %1879 = vmatpush1.bf16.msra.mxu0 %v2572_v0  ;;  %1920 = vmatpush1.bf16.msra.mxu1 %v2574_v1  ;;  %v340_v0 = vld [vmem:[%s3227_s24 + $0x418] sm:$0xff] }
  0x9f   : > { %1880 = vmatprep.subr.bf16.mxu0 %v2557_v2  ;;  %1921 = vmatprep.subr.bf16.mxu1 %v2559_v3  ;;  %v348_v1 = vld [vmem:[%s3227_s24 + $0x458] sm:$0xff]  ;;  %v2700_v2 = vcombine.low %v355_v52, %v363_v54  ;;  %v2702_v3 = vcombine.low %v356_v55, %v364_v56  ;;  %v2593_v52 = vcombine.high %v245_v46, %v253_v47  ;;  %v229_v55 = vld [vmem:[%s3227_s24 + $0xa0] sm:$0xff] }
  0xa0   : > { %v2687_v5 = vcombine.high %v340_v0, %v348_v1  ;;  %v237_v56 = vld [vmem:[%s3227_s24 + $0xe0] sm:$0xff] }
  0xa2   : > { %1881 = vmatpush1.bf16.msra.mxu0 %v2556_v8  ;;  %1922 = vmatpush1.bf16.msra.mxu1 %v2558_v9  ;;  %v326_v8 = vld [vmem:[%s3227_s24 + $0x3a8] sm:$0xff] }
  0xa3   : > { %1882 = vmatprep.subr.bf16.mxu0 %v2797_v10  ;;  %1923 = vmatprep.subr.bf16.mxu1 %v2799_v11  ;;  %v334_v9 = vld [vmem:[%s3227_s24 + $0x3e8] sm:$0xff]  ;;  %v2684_v10 = vcombine.low %v339_v62, %v347_v63  ;;  %v2686_v11 = vcombine.low %v340_v0, %v348_v1  ;;  %v2577_v62 = vcombine.high %v229_v55, %v237_v56  ;;  %v213_v0 = vld [vmem:[%s3227_s24 + $0x20] sm:$0xff] }
  0xa4   : > { %v2675_v14 = vcombine.high %v326_v8, %v334_v9  ;;  %v221_v1 = vld [vmem:[%s3227_s24 + $0x60] sm:$0xff] }
  0xa6   : > { %1883 = vmatpush2.bf16.msra.mxu0 %v2796_v17  ;;  %1924 = vmatpush2.bf16.msra.mxu1 %v2798_v18  ;;  %v310_v17 = vld [vmem:[%s3227_s24 + $0x328] sm:$0xff] }
  0xa7   : > { %1884 = vmatprep.subr.bf16.mxu0 %v2781_v19  ;;  %1925 = vmatprep.subr.bf16.mxu1 %v2783_v20  ;;  %v318_v18 = vld [vmem:[%s3227_s24 + $0x368] sm:$0xff]  ;;  %v2672_v19 = vcombine.low %v325_v6, %v333_v7  ;;  %v2674_v20 = vcombine.low %v326_v8, %v334_v9  ;;  %v2561_v6 = vcombine.high %v213_v0, %v221_v1  ;;  %v453_v8 = vld [vmem:[%s3227_s24 + $0x7a0] sm:$0xff] }
  0xa8   : > { %v2659_v22 = vcombine.high %v310_v17, %v318_v18  ;;  %v461_v9 = vld [vmem:[%s3227_s24 + $0x7e0] sm:$0xff] }
  0xaa   : > { %1885 = vmatpush2.bf16.msra.mxu0 %v2780_v24  ;;  %1926 = vmatpush2.bf16.msra.mxu1 %v2782_v25  ;;  %v294_v24 = vld [vmem:[%s3227_s24 + $0x2a8] sm:$0xff] }
  0xab   : > { %1886 = vmatprep.subr.bf16.mxu0 %v2765_v26  ;;  %1927 = vmatprep.subr.bf16.mxu1 %v2767_v27  ;;  %v302_v25 = vld [vmem:[%s3227_s24 + $0x2e8] sm:$0xff]  ;;  %v2656_v26 = vcombine.low %v309_v15, %v317_v16  ;;  %v2658_v27 = vcombine.low %v310_v17, %v318_v18  ;;  %v2801_v15 = vcombine.high %v453_v8, %v461_v9  ;;  %v437_v17 = vld [vmem:[%s3227_s24 + $0x720] sm:$0xff] }
  0xac   : > { %v2643_v29 = vcombine.high %v294_v24, %v302_v25  ;;  %v445_v18 = vld [vmem:[%s3227_s24 + $0x760] sm:$0xff] }
  0xae   : > { %1887 = vmatpush2.bf16.msra.mxu0 %v2764_v32  ;;  %1928 = vmatpush2.bf16.msra.mxu1 %v2766_v33  ;;  %v278_v32 = vld [vmem:[%s3227_s24 + $0x228] sm:$0xff] }
  0xaf   : > { %1888 = vmatprep.subr.bf16.mxu0 %v2749_v34  ;;  %1929 = vmatprep.subr.bf16.mxu1 %v2751_v35  ;;  %v286_v33 = vld [vmem:[%s3227_s24 + $0x268] sm:$0xff]  ;;  %v2640_v34 = vcombine.low %v293_v53, %v301_v23  ;;  %v2642_v35 = vcombine.low %v294_v24, %v302_v25  ;;  %v2785_v53 = vcombine.high %v437_v17, %v445_v18  ;;  %v421_v24 = vld [vmem:[%s3227_s24 + $0x6a0] sm:$0xff] }
  0xb0   : > { %v2627_v37 = vcombine.high %v278_v32, %v286_v33  ;;  %v429_v25 = vld [vmem:[%s3227_s24 + $0x6e0] sm:$0xff] }
  0xb2   : > { %1889 = vmatpush2.bf16.msra.mxu0 %v2748_v40  ;;  %1930 = vmatpush2.bf16.msra.mxu1 %v2750_v41  ;;  %v262_v40 = vld [vmem:[%s3227_s24 + $0x1a8] sm:$0xff] }
  0xb3   : > { %1890 = vmatprep.subr.bf16.mxu0 %v2733_v42  ;;  %1931 = vmatprep.subr.bf16.mxu1 %v2735_v43  ;;  %v270_v41 = vld [vmem:[%s3227_s24 + $0x1e8] sm:$0xff]  ;;  %v2624_v42 = vcombine.low %v277_v30, %v285_v31  ;;  %v2626_v43 = vcombine.low %v278_v32, %v286_v33  ;;  %v2769_v30 = vcombine.high %v421_v24, %v429_v25  ;;  %v405_v32 = vld [vmem:[%s3227_s24 + $0x620] sm:$0xff] }
  0xb4   : > { %v2611_v45 = vcombine.high %v262_v40, %v270_v41  ;;  %v413_v33 = vld [vmem:[%s3227_s24 + $0x660] sm:$0xff] }
  0xb6   : > { %1891 = vmatpush2.bf16.msra.mxu0 %v2732_v48  ;;  %1932 = vmatpush2.bf16.msra.mxu1 %v2734_v49  ;;  %v246_v48 = vld [vmem:[%s3227_s24 + $0x128] sm:$0xff] }
  0xb7   : > { %1892 = vmatprep.subr.bf16.mxu0 %v2717_v50  ;;  %1933 = vmatprep.subr.bf16.mxu1 %v2719_v51  ;;  %v254_v49 = vld [vmem:[%s3227_s24 + $0x168] sm:$0xff]  ;;  %v2608_v50 = vcombine.low %v261_v38, %v269_v39  ;;  %v2610_v51 = vcombine.low %v262_v40, %v270_v41  ;;  %v2753_v38 = vcombine.high %v405_v32, %v413_v33  ;;  %v389_v40 = vld [vmem:[%s3227_s24 + $0x5a0] sm:$0xff] }
  0xb8   : > { %v2595_v54 = vcombine.high %v246_v48, %v254_v49  ;;  %v397_v41 = vld [vmem:[%s3227_s24 + $0x5e0] sm:$0xff] }
  0xba   : > { %1893 = vmatpush2.bf16.msra.mxu0 %v2716_v58  ;;  %1934 = vmatpush2.bf16.msra.mxu1 %v2718_v59  ;;  %v230_v58 = vld [vmem:[%s3227_s24 + $0xa8] sm:$0xff] }
  0xbb   : > { %1894 = vmatprep.subr.bf16.mxu0 %v2701_v60  ;;  %1935 = vmatprep.subr.bf16.mxu1 %v2703_v61  ;;  %v238_v59 = vld [vmem:[%s3227_s24 + $0xe8] sm:$0xff]  ;;  %v2592_v60 = vcombine.low %v245_v46, %v253_v47  ;;  %v2594_v61 = vcombine.low %v246_v48, %v254_v49  ;;  %v2737_v46 = vcombine.high %v389_v40, %v397_v41  ;;  %v373_v48 = vld [vmem:[%s3227_s24 + $0x520] sm:$0xff] }
  0xbc   : > { %v2579_v63 = vcombine.high %v230_v58, %v238_v59  ;;  %v381_v49 = vld [vmem:[%s3227_s24 + $0x560] sm:$0xff] }
  0xbe   : > { %1895 = vmatpush2.bf16.msra.mxu0 %v2700_v2  ;;  %1936 = vmatpush2.bf16.msra.mxu1 %v2702_v3  ;;  %v214_v2 = vld [vmem:[%s3227_s24 + $0x28] sm:$0xff] }
  0xbf   : > { %1896 = vmatprep.subr.bf16.mxu0 %v2685_v4  ;;  %1937 = vmatprep.subr.bf16.mxu1 %v2687_v5  ;;  %v222_v3 = vld [vmem:[%s3227_s24 + $0x68] sm:$0xff]  ;;  %v2576_v4 = vcombine.low %v229_v55, %v237_v56  ;;  %v2578_v5 = vcombine.low %v230_v58, %v238_v59  ;;  %v2721_v55 = vcombine.high %v373_v48, %v381_v49  ;;  %v357_v58 = vld [vmem:[%s3227_s24 + $0x4a0] sm:$0xff] }
  0xc0   : > { %v2563_v7 = vcombine.high %v214_v2, %v222_v3  ;;  %v365_v59 = vld [vmem:[%s3227_s24 + $0x4e0] sm:$0xff] }
  0xc2   : > { %1897 = vmatpush2.bf16.msra.mxu0 %v2684_v10  ;;  %1938 = vmatpush2.bf16.msra.mxu1 %v2686_v11  ;;  %v454_v10 = vld [vmem:[%s3227_s24 + $0x7a8] sm:$0xff] }
  0xc3   : > { %1948 = vmatprep.subr.bf16.mxu0 %v2673_v13  ;;  %1989 = vmatprep.subr.bf16.mxu1 %v2675_v14  ;;  %v462_v11 = vld [vmem:[%s3227_s24 + $0x7e8] sm:$0xff]  ;;  %v2560_v13 = vcombine.low %v213_v0, %v221_v1  ;;  %v2562_v14 = vcombine.low %v214_v2, %v222_v3  ;;  %v2705_v0 = vcombine.high %v357_v58, %v365_v59  ;;  %v341_v2 = vld [vmem:[%s3227_s24 + $0x420] sm:$0xff] }
  0xc4   : > { %v2803_v16 = vcombine.high %v454_v10, %v462_v11  ;;  %v349_v3 = vld [vmem:[%s3227_s24 + $0x460] sm:$0xff] }
  0xc5   : > { %1899 = vmatmul.mubr.bf16.vlgmr.msra.gmra.mxu0 %v3320_v12  ;;  %1940 = vmatmul.mubr.bf16.vlgmr.msra.gmra.mxu1 %v3320_v12 }
  0xc6   : > { %1949 = vmatpush1.bf16.msra.mxu0 %v2672_v19  ;;  %1990 = vmatpush1.bf16.msra.mxu1 %v2674_v20  ;;  %v438_v19 = vld [vmem:[%s3227_s24 + $0x728] sm:$0xff] }
  0xc7   : > { %1950 = vmatprep.subr.bf16.mxu0 %v2657_v21  ;;  %1991 = vmatprep.subr.bf16.mxu1 %v2659_v22  ;;  %v446_v20 = vld [vmem:[%s3227_s24 + $0x768] sm:$0xff]  ;;  %v2800_v21 = vcombine.low %v453_v8, %v461_v9  ;;  %v2802_v22 = vcombine.low %v454_v10, %v462_v11  ;;  %v2689_v8 = vcombine.high %v341_v2, %v349_v3  ;;  %v327_v10 = vld [vmem:[%s3227_s24 + $0x3b0] sm:$0xff] }
  0xc8   : > { %1980 = vmatprep.mubr.bf16.mxu0 %v3274_v57  ;;  %2021 = vmatprep.mubr.bf16.mxu1 %v3274_v57  ;;  %v2787_v23 = vcombine.high %v438_v19, %v446_v20  ;;  %v335_v11 = vld [vmem:[%s3227_s24 + $0x3f0] sm:$0xff] }
  0xca   : > { %1951 = vmatpush1.bf16.msra.mxu0 %v2656_v26  ;;  %1992 = vmatpush1.bf16.msra.mxu1 %v2658_v27  ;;  %v422_v26 = vld [vmem:[%s3227_s24 + $0x6a8] sm:$0xff] }
  0xcb   : > { %1952 = vmatprep.subr.bf16.mxu0 %v2641_v28  ;;  %1993 = vmatprep.subr.bf16.mxu1 %v2643_v29  ;;  %v430_v27 = vld [vmem:[%s3227_s24 + $0x6e8] sm:$0xff]  ;;  %v2784_v28 = vcombine.low %v437_v17, %v445_v18  ;;  %v2786_v29 = vcombine.low %v438_v19, %v446_v20  ;;  %v2677_v17 = vcombine.high %v327_v10, %v335_v11  ;;  %v311_v19 = vld [vmem:[%s3227_s24 + $0x330] sm:$0xff] }
  0xcc   : > { %v2771_v31 = vcombine.high %v422_v26, %v430_v27  ;;  %v319_v20 = vld [vmem:[%s3227_s24 + $0x370] sm:$0xff] }
  0xce   : > { %1953 = vmatpush1.bf16.msra.mxu0 %v2640_v34  ;;  %1994 = vmatpush1.bf16.msra.mxu1 %v2642_v35  ;;  %v406_v34 = vld [vmem:[%s3227_s24 + $0x628] sm:$0xff] }
  0xcf   : > { %1954 = vmatprep.subr.bf16.mxu0 %v2625_v36  ;;  %1995 = vmatprep.subr.bf16.mxu1 %v2627_v37  ;;  %v414_v35 = vld [vmem:[%s3227_s24 + $0x668] sm:$0xff]  ;;  %v2768_v36 = vcombine.low %v421_v24, %v429_v25  ;;  %v2770_v37 = vcombine.low %v422_v26, %v430_v27  ;;  %v2661_v24 = vcombine.high %v311_v19, %v319_v20  ;;  %v295_v26 = vld [vmem:[%s3227_s24 + $0x2b0] sm:$0xff] }
  0xd0   : > { %v2755_v39 = vcombine.high %v406_v34, %v414_v35  ;;  %v303_v27 = vld [vmem:[%s3227_s24 + $0x2f0] sm:$0xff] }
  0xd2   : > { %1955 = vmatpush1.bf16.msra.mxu0 %v2624_v42  ;;  %1996 = vmatpush1.bf16.msra.mxu1 %v2626_v43  ;;  %v390_v42 = vld [vmem:[%s3227_s24 + $0x5a8] sm:$0xff] }
  0xd3   : > { %1956 = vmatprep.subr.bf16.mxu0 %v2609_v44  ;;  %1997 = vmatprep.subr.bf16.mxu1 %v2611_v45  ;;  %v398_v43 = vld [vmem:[%s3227_s24 + $0x5e8] sm:$0xff]  ;;  %v2752_v44 = vcombine.low %v405_v32, %v413_v33  ;;  %v2754_v45 = vcombine.low %v406_v34, %v414_v35  ;;  %v2645_v32 = vcombine.high %v295_v26, %v303_v27  ;;  %v279_v34 = vld [vmem:[%s3227_s24 + $0x230] sm:$0xff] }
  0xd4   : > { %v2739_v47 = vcombine.high %v390_v42, %v398_v43  ;;  %v287_v35 = vld [vmem:[%s3227_s24 + $0x270] sm:$0xff] }
  0xd6   : > { %1957 = vmatpush1.bf16.msra.mxu0 %v2608_v50  ;;  %1998 = vmatpush1.bf16.msra.mxu1 %v2610_v51  ;;  %v374_v50 = vld [vmem:[%s3227_s24 + $0x528] sm:$0xff] }
  0xd7   : > { %1958 = vmatprep.subr.bf16.mxu0 %v2593_v52  ;;  %1999 = vmatprep.subr.bf16.mxu1 %v2595_v54  ;;  %v382_v51 = vld [vmem:[%s3227_s24 + $0x568] sm:$0xff]  ;;  %v2736_v52 = vcombine.low %v389_v40, %v397_v41  ;;  %v2738_v54 = vcombine.low %v390_v42, %v398_v43  ;;  %v2629_v40 = vcombine.high %v279_v34, %v287_v35  ;;  %v263_v42 = vld [vmem:[%s3227_s24 + $0x1b0] sm:$0xff] }
  0xd8   : > { %v2723_v56 = vcombine.high %v374_v50, %v382_v51  ;;  %v271_v43 = vld [vmem:[%s3227_s24 + $0x1f0] sm:$0xff] }
  0xda   : > { %1959 = vmatpush1.bf16.msra.mxu0 %v2592_v60  ;;  %2000 = vmatpush1.bf16.msra.mxu1 %v2594_v61  ;;  %v358_v60 = vld [vmem:[%s3227_s24 + $0x4a8] sm:$0xff] }
  0xdb   : > { %1960 = vmatprep.subr.bf16.mxu0 %v2577_v62  ;;  %2001 = vmatprep.subr.bf16.mxu1 %v2579_v63  ;;  %v366_v61 = vld [vmem:[%s3227_s24 + $0x4e8] sm:$0xff]  ;;  %v2720_v62 = vcombine.low %v373_v48, %v381_v49  ;;  %v2722_v63 = vcombine.low %v374_v50, %v382_v51  ;;  %v247_v49 = vld [vmem:[%s3227_s24 + $0x130] sm:$0xff]  ;;  %v248_v51 = vld [vmem:[%s3227_s24 + $0x138] sm:$0xff] }
  0xdc   : > { %v2707_v1 = vcombine.high %v358_v60, %v366_v61  ;;  %v255_v50 = vld [vmem:[%s3227_s24 + $0x170] sm:$0xff] }
  0xde   : > { %1961 = vmatpush1.bf16.msra.mxu0 %v2576_v4  ;;  %2002 = vmatpush1.bf16.msra.mxu1 %v2578_v5  ;;  %v342_v4 = vld [vmem:[%s3227_s24 + $0x428] sm:$0xff] }
  0xdf   : > { %1962 = vmatprep.subr.bf16.mxu0 %v2561_v6  ;;  %2003 = vmatprep.subr.bf16.mxu1 %v2563_v7  ;;  %v350_v5 = vld [vmem:[%s3227_s24 + $0x468] sm:$0xff]  ;;  %v2704_v6 = vcombine.low %v357_v58, %v365_v59  ;;  %v2706_v7 = vcombine.low %v358_v60, %v366_v61  ;;  %v231_v59 = vld [vmem:[%s3227_s24 + $0xb0] sm:$0xff]  ;;  %v232_v61 = vld [vmem:[%s3227_s24 + $0xb8] sm:$0xff] }
  0xe0   : > { %v2691_v9 = vcombine.high %v342_v4, %v350_v5  ;;  %v239_v60 = vld [vmem:[%s3227_s24 + $0xf0] sm:$0xff] }
  0xe2   : > { %1963 = vmatpush1.bf16.msra.mxu0 %v2560_v13  ;;  %2004 = vmatpush1.bf16.msra.mxu1 %v2562_v14  ;;  %v328_v13 = vld [vmem:[%s3227_s24 + $0x3b8] sm:$0xff] }
  0xe3   : > { %1964 = vmatprep.subr.bf16.mxu0 %v2801_v15  ;;  %2005 = vmatprep.subr.bf16.mxu1 %v2803_v16  ;;  %v336_v14 = vld [vmem:[%s3227_s24 + $0x3f8] sm:$0xff]  ;;  %v2688_v15 = vcombine.low %v341_v2, %v349_v3  ;;  %v2690_v16 = vcombine.low %v342_v4, %v350_v5  ;;  %v215_v3 = vld [vmem:[%s3227_s24 + $0x30] sm:$0xff] }
  0xe4   : > { %v2679_v18 = vcombine.high %v328_v13, %v336_v14  ;;  %v223_v4 = vld [vmem:[%s3227_s24 + $0x70] sm:$0xff]  ;;  %v216_v5 = vld [vmem:[%s3227_s24 + $0x38] sm:$0xff] }
  0xe6   : > { %1965 = vmatpush2.bf16.msra.mxu0 %v2800_v21  ;;  %2006 = vmatpush2.bf16.msra.mxu1 %v2802_v22  ;;  %v312_v21 = vld [vmem:[%s3227_s24 + $0x338] sm:$0xff] }
  0xe7   : > { %1966 = vmatprep.subr.bf16.mxu0 %v2785_v53  ;;  %2007 = vmatprep.subr.bf16.mxu1 %v2787_v23  ;;  %v320_v22 = vld [vmem:[%s3227_s24 + $0x378] sm:$0xff]  ;;  %v2676_v53 = vcombine.low %v327_v10, %v335_v11  ;;  %v2678_v23 = vcombine.low %v328_v13, %v336_v14  ;;  %v455_v11 = vld [vmem:[%s3227_s24 + $0x7b0] sm:$0xff] }
  0xe8   : > { %v2663_v25 = vcombine.high %v312_v21, %v320_v22  ;;  %v463_v13 = vld [vmem:[%s3227_s24 + $0x7f0] sm:$0xff]  ;;  %v456_v14 = vld [vmem:[%s3227_s24 + $0x7b8] sm:$0xff] }
  0xea   : > { %1967 = vmatpush2.bf16.msra.mxu0 %v2784_v28  ;;  %2008 = vmatpush2.bf16.msra.mxu1 %v2786_v29  ;;  %v296_v28 = vld [vmem:[%s3227_s24 + $0x2b8] sm:$0xff] }
  0xeb   : > { %1968 = vmatprep.subr.bf16.mxu0 %v2769_v30  ;;  %2009 = vmatprep.subr.bf16.mxu1 %v2771_v31  ;;  %v304_v29 = vld [vmem:[%s3227_s24 + $0x2f8] sm:$0xff]  ;;  %v2660_v30 = vcombine.low %v311_v19, %v319_v20  ;;  %v2662_v31 = vcombine.low %v312_v21, %v320_v22  ;;  %v439_v20 = vld [vmem:[%s3227_s24 + $0x730] sm:$0xff] }
  0xec   : > { %v2647_v33 = vcombine.high %v296_v28, %v304_v29  ;;  %v447_v21 = vld [vmem:[%s3227_s24 + $0x770] sm:$0xff]  ;;  %v440_v22 = vld [vmem:[%s3227_s24 + $0x738] sm:$0xff] }
  0xee   : > { %1969 = vmatpush2.bf16.msra.mxu0 %v2768_v36  ;;  %2010 = vmatpush2.bf16.msra.mxu1 %v2770_v37  ;;  %v280_v36 = vld [vmem:[%s3227_s24 + $0x238] sm:$0xff] }
  0xef   : > { %1970 = vmatprep.subr.bf16.mxu0 %v2753_v38  ;;  %2011 = vmatprep.subr.bf16.mxu1 %v2755_v39  ;;  %v288_v37 = vld [vmem:[%s3227_s24 + $0x278] sm:$0xff]  ;;  %v2644_v38 = vcombine.low %v295_v26, %v303_v27  ;;  %v2646_v39 = vcombine.low %v296_v28, %v304_v29  ;;  %v423_v27 = vld [vmem:[%s3227_s24 + $0x6b0] sm:$0xff] }
  0xf0   : > { %v2631_v41 = vcombine.high %v280_v36, %v288_v37  ;;  %v431_v28 = vld [vmem:[%s3227_s24 + $0x6f0] sm:$0xff]  ;;  %v424_v29 = vld [vmem:[%s3227_s24 + $0x6b8] sm:$0xff] }
  0xf2   : > { %1971 = vmatpush2.bf16.msra.mxu0 %v2752_v44  ;;  %2012 = vmatpush2.bf16.msra.mxu1 %v2754_v45  ;;  %v264_v44 = vld [vmem:[%s3227_s24 + $0x1b8] sm:$0xff] }
  0xf3   : > { %1972 = vmatprep.subr.bf16.mxu0 %v2737_v46  ;;  %2013 = vmatprep.subr.bf16.mxu1 %v2739_v47  ;;  %v272_v45 = vld [vmem:[%s3227_s24 + $0x1f8] sm:$0xff]  ;;  %v2628_v46 = vcombine.low %v279_v34, %v287_v35  ;;  %v2613_v47 = vcombine.high %v263_v42, %v271_v43  ;;  %v407_v35 = vld [vmem:[%s3227_s24 + $0x630] sm:$0xff] }
  0xf4   : > { %v2615_v48 = vcombine.high %v264_v44, %v272_v45 }
  0xf6   : > { %1973 = vmatpush2.bf16.msra.mxu0 %v2736_v52  ;;  %2014 = vmatpush2.bf16.msra.mxu1 %v2738_v54  ;;  %v256_v52 = vld [vmem:[%s3227_s24 + $0x178] sm:$0xff]  ;;  %v2612_v54 = vcombine.low %v263_v42, %v271_v43  ;;  %v391_v43 = vld [vmem:[%s3227_s24 + $0x5b0] sm:$0xff] }
  0xf7   : > { %1974 = vmatprep.subr.bf16.mxu0 %v2721_v55  ;;  %2015 = vmatprep.subr.bf16.mxu1 %v2723_v56  ;;  %v2614_v55 = vcombine.low %v264_v44, %v272_v45  ;;  %v2597_v56 = vcombine.high %v247_v49, %v255_v50  ;;  %v2599_v58 = vcombine.high %v248_v51, %v256_v52  ;;  %v399_v44 = vld [vmem:[%s3227_s24 + $0x5f0] sm:$0xff]  ;;  %v392_v45 = vld [vmem:[%s3227_s24 + $0x5b8] sm:$0xff] }
  0xfa   : > { %1975 = vmatpush2.bf16.msra.mxu0 %v2720_v62  ;;  %2016 = vmatpush2.bf16.msra.mxu1 %v2722_v63  ;;  %v240_v62 = vld [vmem:[%s3227_s24 + $0xf8] sm:$0xff]  ;;  %v2596_v63 = vcombine.low %v247_v49, %v255_v50  ;;  %v375_v50 = vld [vmem:[%s3227_s24 + $0x530] sm:$0xff] }
  0xfb   : > { %1976 = vmatprep.subr.bf16.mxu0 %v2705_v0  ;;  %2017 = vmatprep.subr.bf16.mxu1 %v2707_v1  ;;  %v2598_v0 = vcombine.low %v248_v51, %v256_v52  ;;  %v2581_v1 = vcombine.high %v231_v59, %v239_v60  ;;  %v2583_v2 = vcombine.high %v232_v61, %v240_v62  ;;  %v383_v51 = vld [vmem:[%s3227_s24 + $0x570] sm:$0xff]  ;;  %v376_v52 = vld [vmem:[%s3227_s24 + $0x538] sm:$0xff] }
  0xfe   : > { %1977 = vmatpush2.bf16.msra.mxu0 %v2704_v6  ;;  %2018 = vmatpush2.bf16.msra.mxu1 %v2706_v7  ;;  %v224_v6 = vld [vmem:[%s3227_s24 + $0x78] sm:$0xff]  ;;  %v2580_v7 = vcombine.low %v231_v59, %v239_v60  ;;  %v359_v60 = vld [vmem:[%s3227_s24 + $0x4b0] sm:$0xff] }
  0xff   : > { %1978 = vmatprep.subr.bf16.mxu0 %v2689_v8  ;;  %2019 = vmatprep.subr.bf16.mxu1 %v2691_v9  ;;  %v2582_v8 = vcombine.low %v232_v61, %v240_v62  ;;  %v2565_v9 = vcombine.high %v215_v3, %v223_v4  ;;  %v2567_v10 = vcombine.high %v216_v5, %v224_v6  ;;  %v367_v61 = vld [vmem:[%s3227_s24 + $0x4f0] sm:$0xff]  ;;  %v360_v62 = vld [vmem:[%s3227_s24 + $0x4b8] sm:$0xff] }
 0x102   : > { %1979 = vmatpush2.bf16.msra.mxu0 %v2688_v15  ;;  %2020 = vmatpush2.bf16.msra.mxu1 %v2690_v16  ;;  %v464_v15 = vld [vmem:[%s3227_s24 + $0x7f8] sm:$0xff]  ;;  %v2564_v16 = vcombine.low %v215_v3, %v223_v4  ;;  %v343_v4 = vld [vmem:[%s3227_s24 + $0x430] sm:$0xff] }
 0x103   : > { %2030 = vmatprep.subr.bf16.mxu0 %v2677_v17  ;;  %2071 = vmatprep.subr.bf16.mxu1 %v2679_v18  ;;  %v2566_v17 = vcombine.low %v216_v5, %v224_v6  ;;  %v2805_v18 = vcombine.high %v455_v11, %v463_v13  ;;  %v2807_v19 = vcombine.high %v456_v14, %v464_v15  ;;  %v351_v5 = vld [vmem:[%s3227_s24 + $0x470] sm:$0xff]  ;;  %v344_v6 = vld [vmem:[%s3227_s24 + $0x438] sm:$0xff] }
 0x105   : > { %1981 = vmatmul.mubr.bf16.vlgmr.msra.gmra.mxu0 %v3320_v12  ;;  %2022 = vmatmul.mubr.bf16.vlgmr.msra.gmra.mxu1 %v3320_v12 }
 0x106   : > { %2031 = vmatpush1.bf16.msra.mxu0 %v2676_v53  ;;  %2072 = vmatpush1.bf16.msra.mxu1 %v2678_v23  ;;  %v448_v53 = vld [vmem:[%s3227_s24 + $0x778] sm:$0xff]  ;;  %v2804_v23 = vcombine.low %v455_v11, %v463_v13  ;;  %v2692_v13 = vcombine.low %v343_v4, %v351_v5 }
 0x107   : > { %2032 = vmatprep.subr.bf16.mxu0 %v2661_v24  ;;  %2073 = vmatprep.subr.bf16.mxu1 %v2663_v25  ;;  %v2806_v24 = vcombine.low %v456_v14, %v464_v15  ;;  %v2789_v25 = vcombine.high %v439_v20, %v447_v21  ;;  %v2791_v26 = vcombine.high %v440_v22, %v448_v53  ;;  %v3520_v15 = vld [vmem:[#allocation4 + $0x78] sm:$0xff]  }
 0x108   : > { %2062 = vmatprep.mubr.bf16.mxu0 %v3274_v57  ;;  %2103 = vmatprep.mubr.bf16.mxu1 %v3274_v57  ;;  %v2630_v57 = vcombine.low %v280_v36, %v288_v37  ;;  %v415_v36 = vld [vmem:[%s3227_s24 + $0x670] sm:$0xff]  ;;  %v408_v37 = vld [vmem:[%s3227_s24 + $0x638] sm:$0xff] }
 0x10a   : > { %2033 = vmatpush1.bf16.msra.mxu0 %v2660_v30  ;;  %2074 = vmatpush1.bf16.msra.mxu1 %v2662_v31  ;;  %v432_v30 = vld [vmem:[%s3227_s24 + $0x6f8] sm:$0xff]  ;;  %v2788_v31 = vcombine.low %v439_v20, %v447_v21  ;;  %v3531_v21 = vld [vmem:[#allocation4 + $0x30] sm:$0xff]  }
 0x10b   : > { %2034 = vmatprep.subr.bf16.mxu0 %v2645_v32  ;;  %2075 = vmatprep.subr.bf16.mxu1 %v2647_v33  ;;  %v2790_v32 = vcombine.low %v440_v22, %v448_v53  ;;  %v2773_v33 = vcombine.high %v423_v27, %v431_v28  ;;  %v2775_v34 = vcombine.high %v424_v29, %v432_v30 }
 0x10e   : > { %2035 = vmatpush1.bf16.msra.mxu0 %v2644_v38  ;;  %2076 = vmatpush1.bf16.msra.mxu1 %v2646_v39  ;;  %v416_v38 = vld [vmem:[%s3227_s24 + $0x678] sm:$0xff]  ;;  %v2772_v39 = vcombine.low %v423_v27, %v431_v28 }
 0x10f   : > { %2036 = vmatprep.subr.bf16.mxu0 %v2629_v40  ;;  %2077 = vmatprep.subr.bf16.mxu1 %v2631_v41  ;;  %v2774_v40 = vcombine.low %v424_v29, %v432_v30  ;;  %v2757_v41 = vcombine.high %v407_v35, %v415_v36  ;;  %v2759_v42 = vcombine.high %v408_v37, %v416_v38  ;;  %v3539_v29 = vld [vmem:[#allocation4 + $0x28] sm:$0xff]  }
 0x112   : > { %2037 = vmatpush1.bf16.msra.mxu0 %v2628_v46  ;;  %2078 = vmatpush1.bf16.msra.mxu1 %v2630_v57  ;;  %v400_v46 = vld [vmem:[%s3227_s24 + $0x5f8] sm:$0xff]  ;;  %v2756_v57 = vcombine.low %v407_v35, %v415_v36 }
 0x113   : > { %2038 = vmatprep.subr.bf16.mxu0 %v2613_v47  ;;  %2079 = vmatprep.subr.bf16.mxu1 %v2615_v48  ;;  %v2758_v47 = vcombine.low %v408_v37, %v416_v38  ;;  %v2741_v48 = vcombine.high %v391_v43, %v399_v44  ;;  %v2743_v49 = vcombine.high %v392_v45, %v400_v46  ;;  %v3550_v35 = vld [vmem:[#allocation4 + $0x58] sm:$0xff]   ;;  %v3558_v37 = vld [vmem:[#allocation4 + $0x50] sm:$0xff]  }
 0x114   : > { %v3555_v36 = vld [vmem:[#allocation4 + $0x18] sm:$0xff]   ;;  %v3563_v38 = vld [vmem:[#allocation4 + $0x10] sm:$0xff]  }
 0x116   : > { %2039 = vmatpush1.bf16.msra.mxu0 %v2612_v54  ;;  %2080 = vmatpush1.bf16.msra.mxu1 %v2614_v55  ;;  %v384_v54 = vld [vmem:[%s3227_s24 + $0x578] sm:$0xff]  ;;  %v2740_v55 = vcombine.low %v391_v43, %v399_v44  ;;  %v3571_v43 = vld [vmem:[#allocation4 + $0x8] sm:$0xff]  }
 0x117   : > { %2040 = vmatprep.subr.bf16.mxu0 %v2597_v56  ;;  %2081 = vmatprep.subr.bf16.mxu1 %v2599_v58  ;;  %v2742_v56 = vcombine.low %v392_v45, %v400_v46  ;;  %v2725_v58 = vcombine.high %v375_v50, %v383_v51  ;;  %v2727_v59 = vcombine.high %v376_v52, %v384_v54  ;;  %v3574_v45 = vld [vmem:[#allocation4 + $0x40] sm:$0xff]  }
 0x11a   : > { %2041 = vmatpush1.bf16.msra.mxu0 %v2596_v63  ;;  %2082 = vmatpush1.bf16.msra.mxu1 %v2598_v0  ;;  %v368_v63 = vld [vmem:[%s3227_s24 + $0x4f8] sm:$0xff]  ;;  %v2724_v0 = vcombine.low %v375_v50, %v383_v51 }
 0x11b   : > { %2042 = vmatprep.subr.bf16.mxu0 %v2581_v1  ;;  %2083 = vmatprep.subr.bf16.mxu1 %v2583_v2  ;;  %v2726_v1 = vcombine.low %v376_v52, %v384_v54  ;;  %v2709_v2 = vcombine.high %v359_v60, %v367_v61  ;;  %v2711_v3 = vcombine.high %v360_v62, %v368_v63 }
 0x11e   : > { %2043 = vmatpush1.bf16.msra.mxu0 %v2580_v7  ;;  %2084 = vmatpush1.bf16.msra.mxu1 %v2582_v8  ;;  %v352_v7 = vld [vmem:[%s3227_s24 + $0x478] sm:$0xff]  ;;  %v2708_v8 = vcombine.low %v359_v60, %v367_v61 }
 0x11f   : > { %2044 = vmatprep.subr.bf16.mxu0 %v2565_v9  ;;  %2085 = vmatprep.subr.bf16.mxu1 %v2567_v10  ;;  %v2710_v9 = vcombine.low %v360_v62, %v368_v63  ;;  %v2693_v10 = vcombine.high %v343_v4, %v351_v5  ;;  %v2695_v11 = vcombine.high %v344_v6, %v352_v7 }
 0x120   : > { %v2694_v14 = vcombine.low %v344_v6, %v352_v7 }
 0x122   : > { %2045 = vmatpush1.bf16.msra.mxu0 %v2564_v16  ;;  %2086 = vmatpush1.bf16.msra.mxu1 %v2566_v17  ;;  %v3522_v16 = vld [vmem:[#allocation4 + $0x38] sm:$0xff]   ;;  %v3525_v17 = vld [vmem:[#allocation4 + $0x70] sm:$0xff]  }
 0x123   : > { %2046 = vmatprep.subr.bf16.mxu0 %v2805_v18  ;;  %2087 = vmatprep.subr.bf16.mxu1 %v2807_v19 }
 0x126   : > { %2047 = vmatpush2.bf16.msra.mxu0 %v2804_v23  ;;  %2088 = vmatpush2.bf16.msra.mxu1 %v2806_v24  ;;  %v3534_v23 = vld [vmem:[#allocation4 + $0x68] sm:$0xff]  }
 0x127   : > { %2048 = vmatprep.subr.bf16.mxu0 %v2789_v25  ;;  %2089 = vmatprep.subr.bf16.mxu1 %v2791_v26 }
 0x12a   : > { %2049 = vmatpush2.bf16.msra.mxu0 %v2788_v31  ;;  %2090 = vmatpush2.bf16.msra.mxu1 %v2790_v32  ;;  %v3542_v32 = vld [vmem:[#allocation4 + $0x60] sm:$0xff]  }
 0x12b   : > { %2050 = vmatprep.subr.bf16.mxu0 %v2773_v33  ;;  %2091 = vmatprep.subr.bf16.mxu1 %v2775_v34  ;;  %v3547_v34 = vld [vmem:[#allocation4 + $0x20] sm:$0xff]  }
 0x12e   : > { %2051 = vmatpush2.bf16.msra.mxu0 %v2772_v39  ;;  %2092 = vmatpush2.bf16.msra.mxu1 %v2774_v40  ;;  %v3566_v39 = vld [vmem:[#allocation4 + $0x48] sm:$0xff]  }
 0x12f   : > { %2052 = vmatprep.subr.bf16.mxu0 %v2757_v41  ;;  %2093 = vmatprep.subr.bf16.mxu1 %v2759_v42 }
 0x132   : > { %2053 = vmatpush2.bf16.msra.mxu0 %v2756_v57  ;;  %2094 = vmatpush2.bf16.msra.mxu1 %v2758_v47 }
 0x133   : > { %2054 = vmatprep.subr.bf16.mxu0 %v2741_v48  ;;  %2095 = vmatprep.subr.bf16.mxu1 %v2743_v49  ;;  %v3579_v49 = vld [vmem:[#allocation4] sm:$0xff]  }
 0x136   : > { %2055 = vmatpush2.bf16.msra.mxu0 %v2740_v55  ;;  %2096 = vmatpush2.bf16.msra.mxu1 %v2742_v56 }
 0x137   : > { %2056 = vmatprep.subr.bf16.mxu0 %v2725_v58  ;;  %2097 = vmatprep.subr.bf16.mxu1 %v2727_v59 }
 0x13a   : > { %2057 = vmatpush2.bf16.msra.mxu0 %v2724_v0  ;;  %2098 = vmatpush2.bf16.msra.mxu1 %v2726_v1 }
 0x13b   : > { %2058 = vmatprep.subr.bf16.mxu0 %v2709_v2  ;;  %2099 = vmatprep.subr.bf16.mxu1 %v2711_v3 }
 0x13e   : > { %2059 = vmatpush2.bf16.msra.mxu0 %v2708_v8  ;;  %2100 = vmatpush2.bf16.msra.mxu1 %v2710_v9 }
 0x13f   : > { %2060 = vmatprep.subr.bf16.mxu0 %v2693_v10  ;;  %2101 = vmatprep.subr.bf16.mxu1 %v2695_v11 }
 0x142   : > { %2061 = vmatpush2.bf16.msra.mxu0 %v2692_v13  ;;  %2102 = vmatpush2.bf16.msra.mxu1 %v2694_v14 }
 0x143   : > { %2827 = vmatprep.subr.bf16.mxu0 %v3520_v15  ;;  %2849 = vmatprep.subr.bf16.mxu1 %v3520_v15 }
 0x145   : > { %v1818_v18 = vpop.f32.mrf.mxu0  ;;  %2063 = vmatmul.mubr.bf16.vlgmr.msra.gmra.mxu0 %v3320_v12  ;;  %v1859_v20 = vpop.f32.mrf.mxu1  ;;  %2104 = vmatmul.mubr.bf16.vlgmr.msra.gmra.mxu1 %v3320_v12 }
 0x146   : > { %v2112_v19 = vmul.f32 %v1818_v18, %v1818_v18  ;;  %2828 = vmatpush3.bf16.msra.mxu0 %v3522_v16  ;;  %v2114_v22 = vmul.f32 %v1859_v20, %v1859_v20  ;;  %2850 = vmatpush3.bf16.msra.mxu1 %v3522_v16 }
 0x147   : > { %v1820_v53 = vpop.f32.mrf.mxu0  ;;  %2829 = vmatprep.subr.bf16.mxu0 %v3525_v17  ;;  %v1861_v25 = vpop.f32.mrf.mxu1  ;;  %2851 = vmatprep.subr.bf16.mxu1 %v3525_v17 }
 0x148   : > { %v2113_v24 = vmul.f32 %v1820_v53, %v1820_v53  ;;  %v2116_v26 = vadd.f32 %v2114_v22, %v2112_v19  ;;  %v2115_v27 = vmul.f32 %v1861_v25, %v1861_v25 }
 0x149   : > { %v1822_v28 = vpop.f32.mrf.mxu0  ;;  %v1863_v12 = vpop.f32.mrf.mxu1 }
 0x14a   : > { %2830 = vmatpush3.bf16.msra.mxu0 %v3531_v21  ;;  %2986 = vrsqrt.f32 %v2116_v26  ;;  %v2117_v30 = vadd.f32 %v2115_v27, %v2113_v24  ;;  %2852 = vmatpush3.bf16.msra.mxu1 %v3531_v21  ;;  %vm2120_vm1 = vcmp.eq.f32.partialorder %v2116_v26, inf  ;;  %v2123_v50 = vand.u32 2147483648, %v2116_v26 }
 0x14b   : > { %v1823_v31 = vpop.f32.mrf.mxu0  ;;  %2831 = vmatprep.subr.bf16.mxu0 %v3534_v23  ;;  %v1864_v33 = vpop.f32.mrf.mxu1  ;;  %2853 = vmatprep.subr.bf16.mxu1 %v3534_v23  ;;  %vm2122_vm3 = vcmp.eq.f32.partialorder %v2116_v26, 0.0 }
 0x14c   : > { %2988 = vrsqrt.f32 %v2117_v30  ;;  %vm2127_vm0 = vcmp.eq.f32.partialorder %v2117_v30, inf  ;;  %v2130_v46 = vand.u32 2147483648, %v2117_v30  ;;  %vm2129_vm2 = vcmp.eq.f32.partialorder %v2117_v30, 0.0 }
 0x14e   : > { %2832 = vmatpush3.bf16.msra.mxu0 %v3539_v29  ;;  %2854 = vmatpush3.bf16.msra.mxu1 %v3539_v29 }
 0x14f   : > { %2833 = vmatprep.subr.bf16.mxu0 %v3542_v32  ;;  %2855 = vmatprep.subr.bf16.mxu1 %v3542_v32 }
 0x152   : > { %2834 = vmatpush3.bf16.msra.mxu0 %v3547_v34  ;;  %2856 = vmatpush3.bf16.msra.mxu1 %v3547_v34 }
 0x153   : > { %2835 = vmatprep.subr.bf16.mxu0 %v3550_v35  ;;  %2857 = vmatprep.subr.bf16.mxu1 %v3550_v35 }
 0x156   : > { %2836 = vmatpush3.bf16.msra.mxu0 %v3555_v36  ;;  %2858 = vmatpush3.bf16.msra.mxu1 %v3555_v36 }
 0x157   : > { %2837 = vmatprep.subr.bf16.mxu0 %v3558_v37  ;;  %v2987_v40 = vpop.eup %2986  ;;  %2859 = vmatprep.subr.bf16.mxu1 %v3558_v37 }
 0x158   : > { %v2119_v41 = vmul.f32 %v2987_v40, %v2116_v26 }
 0x159   : > { %v2989_v42 = vpop.eup %2988 }
 0x15a   : > { %2838 = vmatpush3.bf16.msra.mxu0 %v3563_v38  ;;  %v2126_v44 = vmul.f32 %v2989_v42, %v2117_v30  ;;  %2860 = vmatpush3.bf16.msra.mxu1 %v3563_v38  ;;  %v2121_v47 = vsel %vm2120_vm1, %v2116_v26, %v2119_v41 }
 0x15b   : > { %2839 = vmatprep.subr.bf16.mxu0 %v3566_v39  ;;  %2861 = vmatprep.subr.bf16.mxu1 %v3566_v39  ;;  %v2124_v52 = vsel %vm2122_vm3, %v2123_v50, %v2121_v47 }
 0x15c   : > { %v2128_v57 = vsel %vm2127_vm0, %v2117_v30, %v2126_v44  ;;  %v2132_v54 = vpack.c.bf16 %v2124_v52, %v2124_v52 }
 0x15d   : > { %v2131_v48 = vsel %vm2129_vm2, %v2130_v46, %v2128_v57 }
 0x15e   : > { %2840 = vmatpush3.bf16.msra.mxu0 %v3571_v43  ;;  %v2133_v51 = vpack.c.bf16 %v2131_v48, %v2131_v48  ;;  %2862 = vmatpush3.bf16.msra.mxu1 %v3571_v43 }
 0x15f   : > { %2841 = vmatprep.subr.bf16.mxu0 %v3574_v45  ;;  %2863 = vmatprep.subr.bf16.mxu1 %v3574_v45 }
 0x160   : > { %2262 = vmatprep.mubr.bf16.mxu0 %v2133_v51 }
 0x162   : > { %2842 = vmatpush3.bf16.msra.mxu0 %v3579_v49  ;;  %2864 = vmatpush3.bf16.msra.mxu1 %v3579_v49 }
 0x163   : > { %2871 = vmatprep.subr.bf16.mxu0 %v3520_v15  ;;  %2893 = vmatprep.subr.bf16.mxu1 %v3520_v15 }
 0x165   : > { %2263 = vmatmul.mubr.bf16.vlgmr.msra.gmra.mxu0 %v2132_v54 }
 0x166   : > { %2872 = vmatpush3.bf16.msra.mxu0 %v3522_v16 }
 0x167   : > { %2873 = vmatprep.subr.bf16.mxu0 %v3525_v17 }
 0x16a   : > { %2874 = vmatpush3.bf16.msra.mxu0 %v3531_v21 }
 0x16b   : > { %2875 = vmatprep.subr.bf16.mxu0 %v3534_v23 }
 0x16e   : > { %2876 = vmatpush3.bf16.msra.mxu0 %v3539_v29 }
 0x16f   : > { %2877 = vmatprep.subr.bf16.mxu0 %v3542_v32 }
 0x172   : > { %2878 = vmatpush3.bf16.msra.mxu0 %v3547_v34 }
 0x173   : > { %2879 = vmatprep.subr.bf16.mxu0 %v3550_v35 }
 0x176   : > { %2880 = vmatpush3.bf16.msra.mxu0 %v3555_v36 }
 0x177   : > { %2881 = vmatprep.subr.bf16.mxu0 %v3558_v37 }
 0x17a   : > { %2882 = vmatpush3.bf16.msra.mxu0 %v3563_v38 }
 0x17b   : > { %2883 = vmatprep.subr.bf16.mxu0 %v3566_v39 }
 0x17e   : > { %2884 = vmatpush3.bf16.msra.mxu0 %v3571_v43 }
 0x17f   : > { %2885 = vmatprep.subr.bf16.mxu0 %v3574_v45 }
 0x182   : > { %2886 = vmatpush3.bf16.msra.mxu0 %v3579_v49 }
 0x185   : > { %v1900_v55 = vpop.f32.mrf.mxu0  ;;  %v1941_v58 = vpop.f32.mrf.mxu1 }
 0x186   : > { %v2271_v56 = vmul.f32 %v1900_v55, %v1900_v55  ;;  %v2273_v59 = vmul.f32 %v1941_v58, %v1941_v58 }
 0x187   : > { %v1902_v60 = vpop.f32.mrf.mxu0  ;;  %v1943_v62 = vpop.f32.mrf.mxu1 }
 0x188   : > { %v2272_v61 = vmul.f32 %v1902_v60, %v1902_v60  ;;  %v2275_v63 = vadd.f32 %v2273_v59, %v2271_v56  ;;  %v2274_v0 = vmul.f32 %v1943_v62, %v1943_v62 }
 0x189   : > { %v1904_v1 = vpop.f32.mrf.mxu0  ;;  %v1945_v2 = vpop.f32.mrf.mxu1 }
 0x18a   : > { %2990 = vrsqrt.f32 %v2275_v63  ;;  %v2276_v3 = vadd.f32 %v2274_v0, %v2272_v61  ;;  %vm2279_vm4 = vcmp.eq.f32.partialorder %v2275_v63, inf  ;;  %v2282_v11 = vand.u32 2147483648, %v2275_v63 }
 0x18b   : > { %v1905_v4 = vpop.f32.mrf.mxu0  ;;  %v1946_v5 = vpop.f32.mrf.mxu1  ;;  %vm2281_vm6 = vcmp.eq.f32.partialorder %v2275_v63, 0.0 }
 0x18c   : > { %2992 = vrsqrt.f32 %v2276_v3  ;;  %vm2286_vm5 = vcmp.eq.f32.partialorder %v2276_v3, inf  ;;  %v2289_v13 = vand.u32 2147483648, %v2276_v3  ;;  %vm2288_vm7 = vcmp.eq.f32.partialorder %v2276_v3, 0.0 }
 0x197   : > { %v2991_v6 = vpop.eup %2990 }
 0x198   : > { %v2278_v7 = vmul.f32 %v2991_v6, %v2275_v63 }
 0x199   : > { %v2993_v8 = vpop.eup %2992 }
 0x19a   : > { %v2285_v9 = vmul.f32 %v2993_v8, %v2276_v3  ;;  %v2280_v10 = vsel %vm2279_vm4, %v2275_v63, %v2278_v7 }
 0x19b   : > { %v2283_v15 = vsel %vm2281_vm6, %v2282_v11, %v2280_v10 }
 0x19c   : > { %v2287_v14 = vsel %vm2286_vm5, %v2276_v3, %v2285_v9  ;;  %v2291_v20 = vpack.c.bf16 %v2283_v15, %v2283_v15 }
 0x19d   : > { %v2290_v18 = vsel %vm2288_vm7, %v2289_v13, %v2287_v14 }
 0x19e   : > { %v2292_v19 = vpack.c.bf16 %v2290_v18, %v2290_v18 }
 0x1a0   : > { %2325 = vmatprep.mubr.bf16.mxu1 %v2292_v19 }
 0x1a1   : > { %2326 = vmatmul.mubr.bf16.vlgmr.msra.gmra.mxu1 %v2291_v20 }
 0x1a2   : > { %2894 = vmatpush3.bf16.msra.mxu1 %v3522_v16 }
 0x1a3   : > { %2895 = vmatprep.subr.bf16.mxu1 %v3525_v17 }
 0x1a6   : > { %2896 = vmatpush3.bf16.msra.mxu1 %v3531_v21 }
 0x1a7   : > { %2897 = vmatprep.subr.bf16.mxu1 %v3534_v23 }
 0x1aa   : > { %2898 = vmatpush3.bf16.msra.mxu1 %v3539_v29 }
 0x1ab   : > { %2899 = vmatprep.subr.bf16.mxu1 %v3542_v32 }
 0x1ae   : > { %2900 = vmatpush3.bf16.msra.mxu1 %v3547_v34 }
 0x1af   : > { %2901 = vmatprep.subr.bf16.mxu1 %v3550_v35 }
 0x1b2   : > { %2902 = vmatpush3.bf16.msra.mxu1 %v3555_v36 }
 0x1b3   : > { %2903 = vmatprep.subr.bf16.mxu1 %v3558_v37 }
 0x1b6   : > { %2904 = vmatpush3.bf16.msra.mxu1 %v3563_v38 }
 0x1b7   : > { %2905 = vmatprep.subr.bf16.mxu1 %v3566_v39 }
 0x1ba   : > { %2906 = vmatpush3.bf16.msra.mxu1 %v3571_v43 }
 0x1bb   : > { %2907 = vmatprep.subr.bf16.mxu1 %v3574_v45 }
 0x1be   : > { %2908 = vmatpush3.bf16.msra.mxu1 %v3579_v49 }
 0x1c5   : > { %v1982_v16 = vpop.f32.mrf.mxu0  ;;  %v2023_v21 = vpop.f32.mrf.mxu1 }
 0x1c6   : > { %v2334_v17 = vmul.f32 %v1982_v16, %v1982_v16  ;;  %v2336_v22 = vmul.f32 %v2023_v21, %v2023_v21 }
 0x1c7   : > { %v1984_v53 = vpop.f32.mrf.mxu0  ;;  %v2025_v24 = vpop.f32.mrf.mxu1 }
 0x1c8   : > { %v2335_v23 = vmul.f32 %v1984_v53, %v1984_v53  ;;  %v2338_v25 = vadd.f32 %v2336_v22, %v2334_v17  ;;  %v2337_v26 = vmul.f32 %v2025_v24, %v2025_v24 }
 0x1c9   : > { %v1986_v27 = vpop.f32.mrf.mxu0  ;;  %v2027_v28 = vpop.f32.mrf.mxu1 }
 0x1ca   : > { %2994 = vrsqrt.f32 %v2338_v25  ;;  %v2339_v12 = vadd.f32 %v2337_v26, %v2335_v23  ;;  %vm2342_vm8 = vcmp.eq.f32.partialorder %v2338_v25, inf  ;;  %v2345_v36 = vand.u32 2147483648, %v2338_v25 }
 0x1cb   : > { %v1987_v29 = vpop.f32.mrf.mxu0  ;;  %v2028_v30 = vpop.f32.mrf.mxu1  ;;  %vm2344_vm10 = vcmp.eq.f32.partialorder %v2338_v25, 0.0 }
 0x1cc   : > { %2996 = vrsqrt.f32 %v2339_v12  ;;  %vm2349_vm9 = vcmp.eq.f32.partialorder %v2339_v12, inf  ;;  %v2352_v37 = vand.u32 2147483648, %v2339_v12  ;;  %vm2351_vm11 = vcmp.eq.f32.partialorder %v2339_v12, 0.0 }
 0x1d7   : > { %v2995_v31 = vpop.eup %2994 }
 0x1d8   : > { %v2341_v32 = vmul.f32 %v2995_v31, %v2338_v25 }
 0x1d9   : > { %v2997_v33 = vpop.eup %2996 }
 0x1da   : > { %v2348_v34 = vmul.f32 %v2997_v33, %v2339_v12  ;;  %v2343_v35 = vsel %vm2342_vm8, %v2338_v25, %v2341_v32 }
 0x1db   : > { %v2346_v39 = vsel %vm2344_vm10, %v2345_v36, %v2343_v35 }
 0x1dc   : > { %v2350_v38 = vsel %vm2349_vm9, %v2339_v12, %v2348_v34  ;;  %v2354_v42 = vpack.c.bf16 %v2346_v39, %v2346_v39 }
 0x1dd   : > { %v2353_v40 = vsel %vm2351_vm11, %v2352_v37, %v2350_v38 }
 0x1de   : > { %v2355_v41 = vpack.c.bf16 %v2353_v40, %v2353_v40 }
 0x1e0   : > { %2388 = vmatprep.mubr.bf16.mxu0 %v2355_v41 }
 0x1e1   : > { %2389 = vmatmul.mubr.bf16.vlgmr.msra.gmra.mxu0 %v2354_v42 }
 0x205   : > { %v2064_v43 = vpop.f32.mrf.mxu0  ;;  %v2105_v45 = vpop.f32.mrf.mxu1 }
 0x206   : > { %v2397_v44 = vmul.f32 %v2064_v43, %v2064_v43  ;;  %v2399_v46 = vmul.f32 %v2105_v45, %v2105_v45 }
 0x207   : > { %v2066_v57 = vpop.f32.mrf.mxu0  ;;  %v2107_v48 = vpop.f32.mrf.mxu1 }
 0x208   : > { %v2398_v47 = vmul.f32 %v2066_v57, %v2066_v57  ;;  %v2401_v49 = vadd.f32 %v2399_v46, %v2397_v44  ;;  %v2400_v50 = vmul.f32 %v2107_v48, %v2107_v48 }
 0x209   : > { %v2068_v51 = vpop.f32.mrf.mxu0  ;;  %v2109_v52 = vpop.f32.mrf.mxu1 }
 0x20a   : > { %2998 = vrsqrt.f32 %v2401_v49  ;;  %v2402_v54 = vadd.f32 %v2400_v50, %v2398_v47  ;;  %vm2405_vm12 = vcmp.eq.f32.partialorder %v2401_v49, inf  ;;  %v2408_v63 = vand.u32 2147483648, %v2401_v49 }
 0x20b   : > { %v2069_v55 = vpop.f32.mrf.mxu0  ;;  %v2110_v56 = vpop.f32.mrf.mxu1  ;;  %vm2407_vm14 = vcmp.eq.f32.partialorder %v2401_v49, 0.0 }
 0x20c   : > { %3000 = vrsqrt.f32 %v2402_v54  ;;  %vm2412_vm13 = vcmp.eq.f32.partialorder %v2402_v54, inf  ;;  %v2415_v0 = vand.u32 2147483648, %v2402_v54  ;;  %vm2414_vm15 = vcmp.eq.f32.partialorder %v2402_v54, 0.0 }
 0x217   : > { %v2999_v58 = vpop.eup %2998 }
 0x218   : > { %v2404_v59 = vmul.f32 %v2999_v58, %v2401_v49 }
 0x219   : > { %v3001_v60 = vpop.eup %3000 }
 0x21a   : > { %v2411_v61 = vmul.f32 %v3001_v60, %v2402_v54  ;;  %v2406_v62 = vsel %vm2405_vm12, %v2401_v49, %v2404_v59 }
 0x21b   : > { %v2409_v2 = vsel %vm2407_vm14, %v2408_v63, %v2406_v62 }
 0x21c   : > { %v2413_v1 = vsel %vm2412_vm13, %v2402_v54, %v2411_v61  ;;  %v2417_v5 = vpack.c.bf16 %v2409_v2, %v2409_v2 }
 0x21d   : > { %v2416_v3 = vsel %vm2414_vm15, %v2415_v0, %v2413_v1 }
 0x21e   : > { %v2418_v4 = vpack.c.bf16 %v2416_v3, %v2416_v3 }
 0x220   : > { %2451 = vmatprep.mubr.bf16.mxu1 %v2418_v4 }
 0x221   : > { %2452 = vmatmul.mubr.bf16.vlgmr.msra.gmra.mxu1 %v2417_v5 }
 0x225   : > { %v2843_v6 = vpop.f32.mrf.mxu0 }
 0x227   : > { %v2844_v7 = vpop.f32.mrf.mxu0 }
 0x228   : > { %v2845_v8 = vadd.f32 %v2844_v7, %v2843_v6 }
 0x229   : > { %v2846_v9 = vpop.f32.mrf.mxu0 }
 0x22a   : > { %2270 = vst [vmem:[%s205_s10] sm:$0xff] %v2845_v8 }
 0x22b   : > { %v2847_v10 = vpop.f32.mrf.mxu0 }
 0x261   : > { %v2865_v11 = vpop.f32.mrf.mxu1 }
 0x263   : > { %v2866_v13 = vpop.f32.mrf.mxu1 }
 0x264   : > { %v2867_v14 = vadd.f32 %v2866_v13, %v2865_v11 }
 0x265   : > { %v2868_v15 = vpop.f32.mrf.mxu1 }
 0x266   : > { %2333 = vst [vmem:[%s205_s10 + $0x8] sm:$0xff] %v2867_v14 }
 0x267   : > { %v2869_v18 = vpop.f32.mrf.mxu1 }
 0x2a1   : > { %v2887_v19 = vpop.f32.mrf.mxu0 }
 0x2a3   : > { %v2888_v20 = vpop.f32.mrf.mxu0 }
 0x2a4   : > { %v2889_v16 = vadd.f32 %v2888_v20, %v2887_v19 }
 0x2a5   : > { %v2890_v17 = vpop.f32.mrf.mxu0 }
 0x2a6   : > { %2396 = vst [vmem:[%s205_s10 + $0x10] sm:$0xff] %v2889_v16 }
 0x2a7   : > { %v2891_v21 = vpop.f32.mrf.mxu0 }
 0x2e1   : > { %v2909_v22 = vpop.f32.mrf.mxu1 }
 0x2e3   : > { %v2910_v53 = vpop.f32.mrf.mxu1 }
 0x2e4   : > { %v2911_v23 = vadd.f32 %v2910_v53, %v2909_v22 }
 0x2e5   : > { %v2912_v24 = vpop.f32.mrf.mxu1 }
 0x2e6   : > { %2459 = vst [vmem:[%s205_s10 + $0x18] sm:$0xff] %v2911_v23 }
 0x2e7   : > { %v2913_v25 = vpop.f32.mrf.mxu1 }
 0x2e8 PF: > { %p14_p7 = scmp.ge.s32.totalorder %s3168_s23, 4   ;;  %s3652_s12 = smov %s3086_s13 }
 0x2e9   : > { %s3653_s13 = smov %s3090_s14  ;;  %s3654_s14 = smov %s3187_s4 }
 0x2ea   : > { %s3655_s15 = smov %s3168_s23  ;;  %16 = sbr.rel (!%p14_p7) target bundleno = 4 (0x4), region = 76 }
 0x2ef   :  { %2482 = vsyncpa [#allocation3], 1 }
 0x2f0   :  { %2484 = vsyncpa [#allocation3 + $0x1], 1 }
 0x2f1   :  { %2485 = vsyncpa [#allocation5], 1 }

</bundles_post_ra>
